<compile_context>
chip_gen: v7x
topology: tpu7x:2x2x1
jax: 0.10.0
libtpu: 0.0.40
codegen_flags: <defaults>
</compile_context>

<pallas_src>
import math

import jax
import jax.numpy as jnp
from jax.experimental import pallas as pl
from jax.experimental.pallas import tpu as pltpu


# ----------------------------------------------------------------------------
# Fused MLP kernel: all layers in one body, activations live in vregs/VMEM.
# ----------------------------------------------------------------------------
def _fused_mlp_kernel(x_ref, *refs):
    """refs = (w1, b1, ..., w4, b4, w_last_row, b_last, o_ref).

    Hidden layers: h = relu(h @ Wi + bi)   (bias/BN pre-folded, bi in f32)
    Final layer  : o = sigmoid(sum(h * w_row, -1) + b_last)  (VPU + lane reduce)
    """
    o_ref = refs[-1]
    wb = refs[:-1]
    n_layers = len(wb) // 2

    h = x_ref[...].astype(jnp.float32)

    # Hidden layers on the MXU: operands in weight dtype (bf16/f32), f32 accum.
    for i in range(n_layers - 1):
        w_ref = wb[2 * i]
        b = wb[2 * i + 1][...]                      # (1, out) f32
        y = jnp.dot(h.astype(w_ref.dtype), w_ref[...],
                    preferred_element_type=jnp.float32) + b
        h = jnp.maximum(y, 0.0)                     # ReLU (Dropout = identity in eval)

    # Final (hidden -> 1) layer: broadcast-multiply + lane reduction on VPU/XLU.
    w_row = wb[-2][...].astype(jnp.float32)         # (1, hidden_last) f32
    b_last = wb[-1][...]                            # (1, 1) f32
    logit = jnp.sum(h * w_row, axis=-1, keepdims=True) + b_last
    o_ref[...] = jax.nn.sigmoid(logit).astype(o_ref.dtype)


def _choose_batch_block(B, max_batch_block):
    """Batch block size: single step for small batches; for large batches make at
    least 2 grid steps (v7x megacore) and keep the block sublane-aligned."""
    if B <= 256:
        return B
    bb = min(max_batch_block, -(-B // 2))           # ceil(B / 2)
    bb = max(8, ((bb + 7) // 8) * 8)
    return bb


def binary_classifier_forward(x, folded_params, *,
                              max_batch_block=1024,
                              vmem_limit_bytes=32 * 1024 * 1024):
    """Fused Pallas forward pass.

    x             : (B, input_size) float array
    folded_params : list of (W, b), W: (in, out), b: (out,), bias/BN folded.
                    The last layer must have out == 1 (per the module spec).
    """
    B, IN = x.shape
    bb = _choose_batch_block(B, max_batch_block)
    grid = (pl.cdiv(B, bb),)

    # Constant operands: full-array VMEM residency, no block pipelining
    # (avoids double-buffering weights that never change block index).
    vmem_spec = pl.BlockSpec(memory_space=pltpu.MemorySpace.VMEM)

    in_specs = [pl.BlockSpec((bb, IN), lambda i: (i, 0))]
    flat_args = [x]

    # Hidden layers: W in its storage dtype (bf16/f32), b always f32.
    for (w, b) in folded_params[:-1]:
        fout = w.shape[1]
        in_specs += [vmem_spec, vmem_spec]
        flat_args += [w, b.reshape(1, fout).astype(jnp.float32)]

    # Final layer: pass W^T as a (1, hidden) f32 row for the in-kernel lane
    # reduction (bypasses the MXU entirely); bias as (1, 1) f32.
    w_last, b_last = folded_params[-1]
    assert w_last.shape[1] == 1, "final layer must map to a single logit"
    in_specs += [vmem_spec, vmem_spec]
    flat_args += [w_last.reshape(1, w_last.shape[0]).astype(jnp.float32),
                  b_last.reshape(1, 1).astype(jnp.float32)]

    out_specs = pl.BlockSpec((bb, 1), lambda i: (i, 0))

    return pl.pallas_call(
        _fused_mlp_kernel,
        out_shape=jax.ShapeDtypeStruct((B, 1), jnp.float32),
        grid=grid,
        in_specs=in_specs,
        out_specs=out_specs,
        compiler_params=pltpu.CompilerParams(
            dimension_semantics=("parallel",),
            vmem_limit_bytes=vmem_limit_bytes),
    )(*flat_args)


# ----------------------------------------------------------------------------
# Parameter construction (deterministic, mirrors the module's __init__)
# ----------------------------------------------------------------------------
_LAYER_SIZES = [448, 320, 320, 256, 1]
_BN_EPS = 1e-5


def init_raw_params(input_size, key):
    """Kaiming-normal (fan_out, relu) weights, zero bias; BN gamma=1, beta=0,
    running_mean=0, running_var=1 (PyTorch defaults after _init_weights).

    Hidden layers: (w, b, gamma, beta, mean, var); final layer: (w, b).
    Weights stored transposed: (in, out)."""
    dims = [input_size] + _LAYER_SIZES
    params = []
    for i in range(len(_LAYER_SIZES)):
        key, wk = jax.random.split(key)
        fan_in, fan_out = dims[i], dims[i + 1]
        std = math.sqrt(2.0 / fan_out)      # kaiming_normal_, mode='fan_out', relu
        w = std * jax.random.normal(wk, (fan_in, fan_out), dtype=jnp.float32)
        b = jnp.zeros((fan_out,), dtype=jnp.float32)
        if i < len(_LAYER_SIZES) - 1:       # hidden layer -> has BatchNorm1d
            gamma = jnp.ones((fan_out,), dtype=jnp.float32)
            beta = jnp.zeros((fan_out,), dtype=jnp.float32)
            running_mean = jnp.zeros((fan_out,), dtype=jnp.float32)
            running_var = jnp.ones((fan_out,), dtype=jnp.float32)
            params.append((w, b, gamma, beta, running_mean, running_var))
        else:
            params.append((w, b))
    return params


def fold_params(raw_params, weight_dtype=jnp.bfloat16):
    """Fold Linear bias + BatchNorm (running stats) into (W', b') per layer.

    Only W is cast to `weight_dtype` (bf16 is the MXU-native operand on
    v5e/v6e/v7x and halves the binding weight DMA); b' stays f32 because it is
    added after f32 accumulation (casting it would only cost precision).
    NOTE: int8 weights would be a further 2x DMA win on v5e/v6e but must NOT be
    used on v7x (its MXU has no integer path); bf16 is the portable choice."""
    folded = []
    for p in raw_params:
        if len(p) == 6:
            w, b, gamma, beta, mean, var = p
            scale = gamma / jnp.sqrt(var + _BN_EPS)
            shift = beta - mean * scale
            w_f = w * scale[None, :]
            b_f = b * scale + shift
        else:
            w_f, b_f = p
        folded.append((w_f.astype(weight_dtype), b_f.astype(jnp.float32)))
    return folded


# ----------------------------------------------------------------------------
# Pure-JAX reference with the original (unfolded) PyTorch eval semantics.
# ----------------------------------------------------------------------------
def _reference_forward(x, raw_params):
    h = x
    n = len(raw_params)
    for i, p in enumerate(raw_params):
        if i < n - 1:
            w, b, gamma, beta, mean, var = p
            y = h @ w + b
            y = (y - mean) / jnp.sqrt(var + _BN_EPS) * gamma + beta   # BatchNorm1d (eval)
            h = jnp.maximum(y, 0.0)                                   # ReLU; Dropout = identity
        else:
            w, b = p
            h = jax.nn.sigmoid(h @ w + b)                             # final Linear + Sigmoid
    return h


if __name__ == "__main__":
    key = jax.random.PRNGKey(0)
    input_size = 32
    batch = 8

    pkey, xkey = jax.random.split(key)
    raw_params = init_raw_params(input_size, pkey)
    x = jax.random.normal(xkey, (batch, input_size), dtype=jnp.float32)

    ref = _reference_forward(x, raw_params)

    # f32-weight configuration: exact-tolerance check vs. PyTorch-eval semantics.
    params_f32 = fold_params(raw_params, weight_dtype=jnp.float32)
    out_f32 = jax.block_until_ready(binary_classifier_forward(x, params_f32))
    assert out_f32.shape == (batch, 1), out_f32.shape
    assert jnp.allclose(out_f32, ref, atol=1e-5, rtol=1e-5), (out_f32, ref)

    # bf16-weight configuration (the production setting): looser tolerance,
    # since weights/MXU operands are bf16 while accumulation/bias stay f32.
    params_bf16 = fold_params(raw_params, weight_dtype=jnp.bfloat16)
    out_bf16 = jax.block_until_ready(binary_classifier_forward(x, params_bf16))
    assert out_bf16.shape == (batch, 1), out_bf16.shape
    assert jnp.allclose(out_bf16, ref, atol=5e-2, rtol=5e-2), (out_bf16, ref)

    print("KERNEL_OK")
</pallas_src>

<mosaic_0001>
module attributes {stable_mosaic.version = 11 : i64} {
  func.func @_fused_mlp_kernel(%arg0: i32, %arg1: memref<8x32xf32, #tpu.memory_space<vmem>>, %arg2: memref<32x448xf32, #tpu.memory_space<vmem>>, %arg3: memref<1x448xf32, #tpu.memory_space<vmem>>, %arg4: memref<448x320xf32, #tpu.memory_space<vmem>>, %arg5: memref<1x320xf32, #tpu.memory_space<vmem>>, %arg6: memref<320x320xf32, #tpu.memory_space<vmem>>, %arg7: memref<1x320xf32, #tpu.memory_space<vmem>>, %arg8: memref<320x256xf32, #tpu.memory_space<vmem>>, %arg9: memref<1x256xf32, #tpu.memory_space<vmem>>, %arg10: memref<1x256xf32, #tpu.memory_space<vmem>>, %arg11: memref<1x1xf32, #tpu.memory_space<vmem>>, %arg12: memref<8x1xf32, #tpu.memory_space<vmem>>) attributes {dimension_semantics = [#tpu.dimension_semantics<parallel>], iteration_bounds = array<i64: 1>, scalar_prefetch = 0 : i64, scratch_operands = 0 : i64, tpu.core_type = #tpu.core_type<tc>, window_params = [{transform_indices = @transform_0, window_bounds = array<i64: 8, 32>}, {pipeline_mode = #tpu.pipeline_mode<synchronous>, transform_indices = @transform_1, window_bounds = array<i64: 32, 448>}, {pipeline_mode = #tpu.pipeline_mode<synchronous>, transform_indices = @transform_2, window_bounds = array<i64: 1, 448>}, {pipeline_mode = #tpu.pipeline_mode<synchronous>, transform_indices = @transform_3, window_bounds = array<i64: 448, 320>}, {pipeline_mode = #tpu.pipeline_mode<synchronous>, transform_indices = @transform_4, window_bounds = array<i64: 1, 320>}, {pipeline_mode = #tpu.pipeline_mode<synchronous>, transform_indices = @transform_5, window_bounds = array<i64: 320, 320>}, {pipeline_mode = #tpu.pipeline_mode<synchronous>, transform_indices = @transform_6, window_bounds = array<i64: 1, 320>}, {pipeline_mode = #tpu.pipeline_mode<synchronous>, transform_indices = @transform_7, window_bounds = array<i64: 320, 256>}, {pipeline_mode = #tpu.pipeline_mode<synchronous>, transform_indices = @transform_8, window_bounds = array<i64: 1, 256>}, {pipeline_mode = #tpu.pipeline_mode<synchronous>, transform_indices = @transform_9, window_bounds = array<i64: 1, 256>}, {pipeline_mode = #tpu.pipeline_mode<synchronous>, transform_indices = @transform_10, window_bounds = array<i64: 1, 1>}, {transform_indices = @transform_11, window_bounds = array<i64: 8, 1>}]} {
    %c0 = arith.constant 0 : index
    %c0_0 = arith.constant 0 : index
    %0 = vector.load %arg1[%c0, %c0_0] : memref<8x32xf32, #tpu.memory_space<vmem>>, vector<8x32xf32>
    %c0_1 = arith.constant 0 : index
    %c0_2 = arith.constant 0 : index
    %1 = vector.load %arg3[%c0_1, %c0_2] : memref<1x448xf32, #tpu.memory_space<vmem>>, vector<1x448xf32>
    %c0_3 = arith.constant 0 : index
    %c0_4 = arith.constant 0 : index
    %2 = vector.load %arg2[%c0_3, %c0_4] : memref<32x448xf32, #tpu.memory_space<vmem>>, vector<32x448xf32>
    %cst = arith.constant dense<0.000000e+00> : vector<8x448xf32>
    %3 = tpu.matmul %0, %2, %cst {dimension_numbers = #tpu.dot_dimension_numbers<[1], [0], [0], [1], [0, 0, 1, 1], [], []>} : vector<8x32xf32>, vector<32x448xf32>, vector<8x448xf32> -> vector<8x448xf32>
    %4 = vector.broadcast %1 : vector<1x448xf32> to vector<8x448xf32>
    %5 = arith.addf %3, %4 : vector<8x448xf32>
    %cst_5 = arith.constant 0.000000e+00 : f32
    %6 = vector.broadcast %cst_5 : f32 to vector<8x448xf32>
    %7 = arith.maximumf %5, %6 : vector<8x448xf32>
    %c0_6 = arith.constant 0 : index
    %c0_7 = arith.constant 0 : index
    %8 = vector.load %arg5[%c0_6, %c0_7] : memref<1x320xf32, #tpu.memory_space<vmem>>, vector<1x320xf32>
    %c0_8 = arith.constant 0 : index
    %c0_9 = arith.constant 0 : index
    %9 = vector.load %arg4[%c0_8, %c0_9] : memref<448x320xf32, #tpu.memory_space<vmem>>, vector<448x320xf32>
    %cst_10 = arith.constant dense<0.000000e+00> : vector<8x320xf32>
    %10 = tpu.matmul %7, %9, %cst_10 {dimension_numbers = #tpu.dot_dimension_numbers<[1], [0], [0], [1], [0, 0, 1, 1], [], []>} : vector<8x448xf32>, vector<448x320xf32>, vector<8x320xf32> -> vector<8x320xf32>
    %11 = vector.broadcast %8 : vector<1x320xf32> to vector<8x320xf32>
    %12 = arith.addf %10, %11 : vector<8x320xf32>
    %cst_11 = arith.constant 0.000000e+00 : f32
    %13 = vector.broadcast %cst_11 : f32 to vector<8x320xf32>
    %14 = arith.maximumf %12, %13 : vector<8x320xf32>
    %c0_12 = arith.constant 0 : index
    %c0_13 = arith.constant 0 : index
    %15 = vector.load %arg7[%c0_12, %c0_13] : memref<1x320xf32, #tpu.memory_space<vmem>>, vector<1x320xf32>
    %c0_14 = arith.constant 0 : index
    %c0_15 = arith.constant 0 : index
    %16 = vector.load %arg6[%c0_14, %c0_15] : memref<320x320xf32, #tpu.memory_space<vmem>>, vector<320x320xf32>
    %cst_16 = arith.constant dense<0.000000e+00> : vector<8x320xf32>
    %17 = tpu.matmul %14, %16, %cst_16 {dimension_numbers = #tpu.dot_dimension_numbers<[1], [0], [0], [1], [0, 0, 1, 1], [], []>} : vector<8x320xf32>, vector<320x320xf32>, vector<8x320xf32> -> vector<8x320xf32>
    %18 = vector.broadcast %15 : vector<1x320xf32> to vector<8x320xf32>
    %19 = arith.addf %17, %18 : vector<8x320xf32>
    %cst_17 = arith.constant 0.000000e+00 : f32
    %20 = vector.broadcast %cst_17 : f32 to vector<8x320xf32>
    %21 = arith.maximumf %19, %20 : vector<8x320xf32>
    %c0_18 = arith.constant 0 : index
    %c0_19 = arith.constant 0 : index
    %22 = vector.load %arg9[%c0_18, %c0_19] : memref<1x256xf32, #tpu.memory_space<vmem>>, vector<1x256xf32>
    %c0_20 = arith.constant 0 : index
    %c0_21 = arith.constant 0 : index
    %23 = vector.load %arg8[%c0_20, %c0_21] : memref<320x256xf32, #tpu.memory_space<vmem>>, vector<320x256xf32>
    %cst_22 = arith.constant dense<0.000000e+00> : vector<8x256xf32>
    %24 = tpu.matmul %21, %23, %cst_22 {dimension_numbers = #tpu.dot_dimension_numbers<[1], [0], [0], [1], [0, 0, 1, 1], [], []>} : vector<8x320xf32>, vector<320x256xf32>, vector<8x256xf32> -> vector<8x256xf32>
    %25 = vector.broadcast %22 : vector<1x256xf32> to vector<8x256xf32>
    %26 = arith.addf %24, %25 : vector<8x256xf32>
    %cst_23 = arith.constant 0.000000e+00 : f32
    %27 = vector.broadcast %cst_23 : f32 to vector<8x256xf32>
    %28 = arith.maximumf %26, %27 : vector<8x256xf32>
    %c0_24 = arith.constant 0 : index
    %c0_25 = arith.constant 0 : index
    %29 = vector.load %arg10[%c0_24, %c0_25] : memref<1x256xf32, #tpu.memory_space<vmem>>, vector<1x256xf32>
    %c0_26 = arith.constant 0 : index
    %c0_27 = arith.constant 0 : index
    %30 = vector.load %arg11[%c0_26, %c0_27] : memref<1x1xf32, #tpu.memory_space<vmem>>, vector<1x1xf32>
    %31 = vector.broadcast %29 : vector<1x256xf32> to vector<8x256xf32>
    %32 = arith.mulf %28, %31 : vector<8x256xf32>
    %cst_28 = arith.constant dense<0.000000e+00> : vector<8xf32>
    %33 = vector.multi_reduction <add>, %32, %cst_28 [1] : vector<8x256xf32> to vector<8xf32>
    %34 = vector.shape_cast %33 : vector<8xf32> to vector<8x1xf32>
    %35 = vector.broadcast %30 : vector<1x1xf32> to vector<8x1xf32>
    %36 = arith.addf %34, %35 : vector<8x1xf32>
    %37 = arith.negf %36 : vector<8x1xf32>
    %38 = math.exp %37 : vector<8x1xf32>
    %cst_29 = arith.constant 1.000000e+00 : f32
    %39 = vector.broadcast %cst_29 : f32 to vector<8x1xf32>
    %40 = arith.addf %39, %38 : vector<8x1xf32>
    %41 = arith.divf %39, %40 : vector<8x1xf32>
    %c0_30 = arith.constant 0 : index
    %c0_31 = arith.constant 0 : index
    %42 = vector.load %arg12[%c0_30, %c0_31] : memref<8x1xf32, #tpu.memory_space<vmem>>, vector<8x1xf32>
    tpu.vector_store %arg12[%c0_30, %c0_31], %41 {strides = array<i32>} : memref<8x1xf32, #tpu.memory_space<vmem>>, vector<8x1xf32>,
    return
  }
  func.func @transform_0(%arg0: i32) -> (i32, i32) {
    %c0_i32 = arith.constant 0 : i32
    %c0_i32_0 = arith.constant 0 : i32
    return %arg0, %c0_i32 : i32, i32
  }
  func.func @transform_1(%arg0: i32) -> (i32, i32) {
    %c0_i32 = arith.constant 0 : i32
    %c0_i32_0 = arith.constant 0 : i32
    %c0_i32_1 = arith.constant 0 : i32
    return %c0_i32, %c0_i32_0 : i32, i32
  }
  func.func @transform_2(%arg0: i32) -> (i32, i32) {
    %c0_i32 = arith.constant 0 : i32
    %c0_i32_0 = arith.constant 0 : i32
    %c0_i32_1 = arith.constant 0 : i32
    return %c0_i32, %c0_i32_0 : i32, i32
  }
  func.func @transform_3(%arg0: i32) -> (i32, i32) {
    %c0_i32 = arith.constant 0 : i32
    %c0_i32_0 = arith.constant 0 : i32
    %c0_i32_1 = arith.constant 0 : i32
    return %c0_i32, %c0_i32_0 : i32, i32
  }
  func.func @transform_4(%arg0: i32) -> (i32, i32) {
    %c0_i32 = arith.constant 0 : i32
    %c0_i32_0 = arith.constant 0 : i32
    %c0_i32_1 = arith.constant 0 : i32
    return %c0_i32, %c0_i32_0 : i32, i32
  }
  func.func @transform_5(%arg0: i32) -> (i32, i32) {
    %c0_i32 = arith.constant 0 : i32
    %c0_i32_0 = arith.constant 0 : i32
    %c0_i32_1 = arith.constant 0 : i32
    return %c0_i32, %c0_i32_0 : i32, i32
  }
  func.func @transform_6(%arg0: i32) -> (i32, i32) {
    %c0_i32 = arith.constant 0 : i32
    %c0_i32_0 = arith.constant 0 : i32
    %c0_i32_1 = arith.constant 0 : i32
    return %c0_i32, %c0_i32_0 : i32, i32
  }
  func.func @transform_7(%arg0: i32) -> (i32, i32) {
    %c0_i32 = arith.constant 0 : i32
    %c0_i32_0 = arith.constant 0 : i32
    %c0_i32_1 = arith.constant 0 : i32
    return %c0_i32, %c0_i32_0 : i32, i32
  }
  func.func @transform_8(%arg0: i32) -> (i32, i32) {
    %c0_i32 = arith.constant 0 : i32
    %c0_i32_0 = arith.constant 0 : i32
    %c0_i32_1 = arith.constant 0 : i32
    return %c0_i32, %c0_i32_0 : i32, i32
  }
  func.func @transform_9(%arg0: i32) -> (i32, i32) {
    %c0_i32 = arith.constant 0 : i32
    %c0_i32_0 = arith.constant 0 : i32
    %c0_i32_1 = arith.constant 0 : i32
    return %c0_i32, %c0_i32_0 : i32, i32
  }
  func.func @transform_10(%arg0: i32) -> (i32, i32) {
    %c0_i32 = arith.constant 0 : i32
    %c0_i32_0 = arith.constant 0 : i32
    %c0_i32_1 = arith.constant 0 : i32
    return %c0_i32, %c0_i32_0 : i32, i32
  }
  func.func @transform_11(%arg0: i32) -> (i32, i32) {
    %c0_i32 = arith.constant 0 : i32
    %c0_i32_0 = arith.constant 0 : i32
    return %arg0, %c0_i32 : i32, i32
  }
}

</mosaic_0001>

<bundles_post_ra>
// kernel: tpu_custom_call.1
= control target key start
LH: loop header
LB: loop body
LE: loop exit
PB: predicated region body
PF: predicated region fallthrough
CT: control target
= control target key end

     0   :  { %v1930_v3 = vmov 0.0   ;;  %vm79_vm0 = vcmask 261120   ;;  %vm414_vm1 = vcmask 523264   ;;  %vm1932_vm2 = vmmov 0   ;;  %s3242_s1 = inlined_call_operand.vmem [shape: f32[32,448], index: 1, kind: input, shape index: {}]   ;;  %s3243_s0 = inlined_call_operand.vmem [shape: f32[8,32], index: 0, kind: input, shape index: {}]   ;;  %s3244_s3 = inlined_call_operand.vmem [shape: f32[448,320], index: 3, kind: input, shape index: {}]   ;;  %s3245_s2 = inlined_call_operand.vmem [shape: f32[1,448], index: 2, kind: input, shape index: {}]   ;;  %s3246_s5 = inlined_call_operand.vmem [shape: f32[320,320], index: 5, kind: input, shape index: {}]   ;;  %s3247_s4 = inlined_call_operand.vmem [shape: f32[1,320], index: 4, kind: input, shape index: {}]   ;;  %s3248_s7 = inlined_call_operand.vmem [shape: f32[320,256], index: 7, kind: input, shape index: {}]   ;;  %s3249_s6 = inlined_call_operand.vmem [shape: f32[1,320], index: 6, kind: input, shape index: {}]   ;;  %s3250_s10 = inlined_call_operand.<no memory space> [shape: f32[1,1], index: 10, kind: input, shape index: {}]   ;;  %s3251_s8 = inlined_call_operand.vmem [shape: f32[1,256], index: 8, kind: input, shape index: {}]   ;;  %s3252_s9 = inlined_call_operand.vmem [shape: f32[1,256], index: 9, kind: input, shape index: {}]   ;;  %s3253_s11 = inlined_call_operand.vmem [shape: f32[8,1], index: 11, kind: output, shape index: {}]  }
   0x1   :  { %v43_v0 = vld [vmem:[%s3242_s1 + $0x8] sm:$0xff]  ;;  %v42_v2 = vld [vmem:[%s3242_s1] sm:$0xff]  ;;  %147 = vmatprep.mubr.f32.mxu0 %v1930_v3  ;;  %v45_v12 = vld [vmem:[%s3242_s1 + $0x18] sm:$0xff]  ;;  %vm1398_vm3 = vcmask 7168  }
   0x2   :  { %v47_v1 = vld [vmem:[%s3242_s1 + $0x28] sm:$0xff]  ;;  %v46_v5 = vld [vmem:[%s3242_s1 + $0x20] sm:$0xff]  ;;  %v49_v13 = vld [vmem:[%s3242_s1 + $0x38] sm:$0xff] }
   0x3   :  { %v1511_v4 = vpack.c.bf16 %v47_v1, %v43_v0  ;;  %v51_v6 = vld [vmem:[%s3242_s1 + $0x48] sm:$0xff]  ;;  %v1513_v8 = vpack.c.bf16 %v46_v5, %v42_v2  ;;  %v50_v10 = vld [vmem:[%s3242_s1 + $0x40] sm:$0xff]  ;;  %v1519_v15 = vpack.c.bf16 %v49_v13, %v45_v12  ;;  %v44_v16 = vld [vmem:[%s3242_s1 + $0x10] sm:$0xff] }
   0x4   :  { %v55_v7 = vld [vmem:[%s3242_s1 + $0x68] sm:$0xff]  ;;  %v54_v11 = vld [vmem:[%s3242_s1 + $0x60] sm:$0xff]  ;;  %v48_v17 = vld [vmem:[%s3242_s1 + $0x30] sm:$0xff] }
   0x5   :  { %v1515_v9 = vpack.c.bf16 %v55_v7, %v51_v6  ;;  %1512 = vmatprep.subr.bf16.mxu0 %v1511_v4  ;;  %v1517_v14 = vpack.c.bf16 %v54_v11, %v50_v10  ;;  %v53_v18 = vld [vmem:[%s3242_s1 + $0x58] sm:$0xff]  ;;  %v40_v20 = vld [vmem:[%s3243_s0] sm:$0xff]  ;;  %v1521_v21 = vpack.c.bf16 %v48_v17, %v44_v16  ;;  %v52_v23 = vld [vmem:[%s3242_s1 + $0x50] sm:$0xff] }
   0x6   :  { %1514 = vmatpush1.bf16.msra.mxu0 %v1513_v8  ;;  %v57_v19 = vld [vmem:[%s3242_s1 + $0x78] sm:$0xff]  ;;  %v56_v24 = vld [vmem:[%s3242_s1 + $0x70] sm:$0xff]  ;;  %v231_v25 = vld [vmem:[%s3244_s3 + $0x8] sm:$0xff] }
   0x7   :  { %1516 = vmatprep.subr.bf16.mxu0 %v1515_v9  ;;  %v1523_v22 = vpack.c.bf16 %v57_v19, %v53_v18  ;;  %v234_v26 = vld [vmem:[%s3244_s3 + $0x20] sm:$0xff]  ;;  %v1525_v27 = vpack.c.bf16 %v56_v24, %v52_v23  ;;  %v233_v30 = vld [vmem:[%s3244_s3 + $0x18] sm:$0xff]  ;;  %v327_v31 = vld [vmem:[%s3244_s3 + $0x308] sm:$0xff] }
   0x8   :  { %v1527_v28 = vpack.c.bf16 %v234_v26, %v231_v25  ;;  %v230_v29 = vld [vmem:[%s3244_s3] sm:$0xff]  ;;  %v237_v32 = vld [vmem:[%s3244_s3 + $0x38] sm:$0xff]  ;;  %v240_v33 = vld [vmem:[%s3244_s3 + $0x50] sm:$0xff] }
   0x9   :  { %v330_v34 = vld [vmem:[%s3244_s3 + $0x320] sm:$0xff]  ;;  %v329_v37 = vld [vmem:[%s3244_s3 + $0x318] sm:$0xff]  ;;  %v1529_v38 = vpack.c.bf16 %v233_v30, %v230_v29  ;;  %v336_v41 = vld [vmem:[%s3244_s3 + $0x350] sm:$0xff]  ;;  %v1531_v42 = vpack.c.bf16 %v240_v33, %v237_v32 }
   0xa   :  { %1518 = vmatpush1.bf16.msra.mxu0 %v1517_v14  ;;  %v1591_v35 = vpack.c.bf16 %v330_v34, %v327_v31  ;;  %v326_v36 = vld [vmem:[%s3244_s3 + $0x300] sm:$0xff]  ;;  %v333_v40 = vld [vmem:[%s3244_s3 + $0x338] sm:$0xff]  ;;  %v236_v43 = vld [vmem:[%s3244_s3 + $0x30] sm:$0xff] }
   0xb   :  { %1520 = vmatprep.subr.bf16.mxu0 %v1519_v15  ;;  %v1593_v39 = vpack.c.bf16 %v329_v37, %v326_v36  ;;  %v239_v44 = vld [vmem:[%s3244_s3 + $0x48] sm:$0xff]  ;;  %v1595_v45 = vpack.c.bf16 %v336_v41, %v333_v40  ;;  %v332_v46 = vld [vmem:[%s3244_s3 + $0x330] sm:$0xff]  ;;  %v246_v48 = vld [vmem:[%s3244_s3 + $0x80] sm:$0xff] }
   0xc   :  { %1592 = vmatprep.subr.bf16.mxu1 %v1591_v35  ;;  %v243_v47 = vld [vmem:[%s3244_s3 + $0x68] sm:$0xff]  ;;  %v342_v52 = vld [vmem:[%s3244_s3 + $0x380] sm:$0xff]  ;;  %v1533_v53 = vpack.c.bf16 %v239_v44, %v236_v43  ;;  %v341_v56 = vld [vmem:[%s3244_s3 + $0x378] sm:$0xff] }
   0xd   :  { %1404 = vmatmul.mubr.msk.f32.vlgmr.msra.gmra.mrb[0].mxu0 %vm79_vm0, %v40_v20  ;;  %1594 = vmatpush1.bf16.msra.mxu1 %v1593_v39  ;;  %v335_v49 = vld [vmem:[%s3244_s3 + $0x348] sm:$0xff]  ;;  %v338_v55 = vld [vmem:[%s3244_s3 + $0x360] sm:$0xff]  ;;  %v1535_v57 = vpack.c.bf16 %v246_v48, %v243_v47  ;;  %v245_v59 = vld [vmem:[%s3244_s3 + $0x78] sm:$0xff] }
   0xe   :  { %1522 = vmatpush1.bf16.msra.mxu0 %v1521_v21  ;;  %218 = vmatprep.mubr.f32.mxu0 %v1930_v3  ;;  %v1597_v50 = vpack.c.bf16 %v335_v49, %v332_v46  ;;  %v339_v51 = vld [vmem:[%s3244_s3 + $0x368] sm:$0xff]  ;;  %v242_v58 = vld [vmem:[%s3244_s3 + $0x60] sm:$0xff]  ;;  %v345_v60 = vld [vmem:[%s3244_s3 + $0x398] sm:$0xff]  ;;  %v1601_v63 = vpack.c.bf16 %v341_v56, %v338_v55 }
   0xf   :  { %1524 = vmatprep.subr.bf16.mxu0 %v1523_v22  ;;  %1596 = vmatprep.subr.bf16.mxu1 %v1595_v45  ;;  %v1599_v54 = vpack.c.bf16 %v342_v52, %v339_v51  ;;  %v249_v61 = vld [vmem:[%s3244_s3 + $0x98] sm:$0xff]  ;;  %v252_v62 = vld [vmem:[%s3244_s3 + $0xb0] sm:$0xff]  ;;  %v347_v4 = vld [vmem:[%s3244_s3 + $0x3a8] sm:$0xff]  ;;  %v1537_v5 = vpack.c.bf16 %v245_v59, %v242_v58 }
  0x10   :  { %v348_v0 = vld [vmem:[%s3244_s3 + $0x3b0] sm:$0xff]  ;;  %v351_v6 = vld [vmem:[%s3244_s3 + $0x3c8] sm:$0xff]  ;;  %v354_v7 = vld [vmem:[%s3244_s3 + $0x3e0] sm:$0xff]  ;;  %v1539_v8 = vpack.c.bf16 %v252_v62, %v249_v61 }
  0x11   :  { %1598 = vmatpush1.bf16.msra.mxu1 %v1597_v50  ;;  %v1603_v1 = vpack.c.bf16 %v348_v0, %v345_v60  ;;  %v344_v2 = vld [vmem:[%s3244_s3 + $0x390] sm:$0xff]  ;;  %v251_v10 = vld [vmem:[%s3244_s3 + $0xa8] sm:$0xff]  ;;  %v258_v12 = vld [vmem:[%s3244_s3 + $0xe0] sm:$0xff]  ;;  %v1607_v14 = vpack.c.bf16 %v354_v7, %v351_v6 }
  0x12   :  { %1526 = vmatpush1.bf16.msra.mxu0 %v1525_v27  ;;  %1600 = vmatprep.subr.bf16.mxu1 %v1599_v54  ;;  %v248_v9 = vld [vmem:[%s3244_s3 + $0x90] sm:$0xff]  ;;  %v255_v11 = vld [vmem:[%s3244_s3 + $0xc8] sm:$0xff]  ;;  %v1605_v13 = vpack.c.bf16 %v347_v4, %v344_v2  ;;  %v350_v15 = vld [vmem:[%s3244_s3 + $0x3c0] sm:$0xff] }
  0x13   :  { %1528 = vmatprep.subr.bf16.mxu0 %v1527_v28  ;;  %v353_v16 = vld [vmem:[%s3244_s3 + $0x3d8] sm:$0xff]  ;;  %v1541_v17 = vpack.c.bf16 %v251_v10, %v248_v9  ;;  %v360_v19 = vld [vmem:[%s3244_s3 + $0x410] sm:$0xff]  ;;  %v254_v21 = vld [vmem:[%s3244_s3 + $0xc0] sm:$0xff] }
  0x14   :  { %v357_v18 = vld [vmem:[%s3244_s3 + $0x3f8] sm:$0xff]  ;;  %v264_v24 = vld [vmem:[%s3244_s3 + $0x110] sm:$0xff]  ;;  %v1609_v25 = vpack.c.bf16 %v353_v16, %v350_v15  ;;  %v359_v28 = vld [vmem:[%s3244_s3 + $0x408] sm:$0xff] }
  0x15   :  { %1405 = vmatmul.mubr.msk.f32.vlgmr.msra.gmra.mrb[2].mxu0 %vm79_vm0, %v40_v20  ;;  %1602 = vmatpush1.bf16.msra.mxu1 %v1601_v63  ;;  %v1543_v20 = vpack.c.bf16 %v258_v12, %v255_v11  ;;  %v257_v22 = vld [vmem:[%s3244_s3 + $0xd8] sm:$0xff]  ;;  %v1611_v26 = vpack.c.bf16 %v360_v19, %v357_v18  ;;  %v356_v27 = vld [vmem:[%s3244_s3 + $0x3f0] sm:$0xff]  ;;  %v363_v30 = vld [vmem:[%s3244_s3 + $0x428] sm:$0xff] }
  0x16   :  { %1530 = vmatpush1.bf16.msra.mxu0 %v1529_v38  ;;  %1604 = vmatprep.subr.bf16.mxu1 %v1603_v1  ;;  %v261_v23 = vld [vmem:[%s3244_s3 + $0xf8] sm:$0xff]  ;;  %v1545_v29 = vpack.c.bf16 %v257_v22, %v254_v21  ;;  %v366_v31 = vld [vmem:[%s3244_s3 + $0x440] sm:$0xff]  ;;  %v260_v33 = vld [vmem:[%s3244_s3 + $0xf0] sm:$0xff]  ;;  %v1613_v37 = vpack.c.bf16 %v359_v28, %v356_v27 }
  0x17   :  { %1532 = vmatprep.subr.bf16.mxu0 %v1531_v42  ;;  %v1547_v32 = vpack.c.bf16 %v264_v24, %v261_v23  ;;  %v263_v34 = vld [vmem:[%s3244_s3 + $0x108] sm:$0xff]  ;;  %v270_v36 = vld [vmem:[%s3244_s3 + $0x140] sm:$0xff]  ;;  %v1615_v38 = vpack.c.bf16 %v366_v31, %v363_v30  ;;  %v365_v40 = vld [vmem:[%s3244_s3 + $0x438] sm:$0xff] }
  0x18   :  { %v267_v35 = vld [vmem:[%s3244_s3 + $0x128] sm:$0xff]  ;;  %v362_v39 = vld [vmem:[%s3244_s3 + $0x420] sm:$0xff]  ;;  %v1549_v41 = vpack.c.bf16 %v263_v34, %v260_v33  ;;  %v369_v42 = vld [vmem:[%s3244_s3 + $0x458] sm:$0xff] }
  0x19   :  { %1606 = vmatpush1.bf16.msra.mxu1 %v1605_v13  ;;  %v372_v43 = vld [vmem:[%s3244_s3 + $0x470] sm:$0xff]  ;;  %v1551_v44 = vpack.c.bf16 %v270_v36, %v267_v35  ;;  %v266_v45 = vld [vmem:[%s3244_s3 + $0x120] sm:$0xff]  ;;  %v269_v46 = vld [vmem:[%s3244_s3 + $0x138] sm:$0xff]  ;;  %v1617_v49 = vpack.c.bf16 %v365_v40, %v362_v39 }
  0x1a   :  { %1534 = vmatpush1.bf16.msra.mxu0 %v1533_v53  ;;  %1608 = vmatprep.subr.bf16.mxu1 %v1607_v14  ;;  %v273_v47 = vld [vmem:[%s3244_s3 + $0x158] sm:$0xff]  ;;  %v276_v48 = vld [vmem:[%s3244_s3 + $0x170] sm:$0xff]  ;;  %v1619_v50 = vpack.c.bf16 %v372_v43, %v369_v42  ;;  %v371_v52 = vld [vmem:[%s3244_s3 + $0x468] sm:$0xff]  ;;  %v1553_v53 = vpack.c.bf16 %v269_v46, %v266_v45 }
  0x1b   :  { %1536 = vmatprep.subr.bf16.mxu0 %v1535_v57  ;;  %v368_v51 = vld [vmem:[%s3244_s3 + $0x450] sm:$0xff]  ;;  %v375_v54 = vld [vmem:[%s3244_s3 + $0x488] sm:$0xff]  ;;  %v378_v55 = vld [vmem:[%s3244_s3 + $0x4a0] sm:$0xff]  ;;  %v1555_v56 = vpack.c.bf16 %v276_v48, %v273_v47 }
  0x1c   :  { %v272_v57 = vld [vmem:[%s3244_s3 + $0x150] sm:$0xff]  ;;  %v275_v58 = vld [vmem:[%s3244_s3 + $0x168] sm:$0xff]  ;;  %v282_v60 = vld [vmem:[%s3244_s3 + $0x1a0] sm:$0xff]  ;;  %v1621_v61 = vpack.c.bf16 %v371_v52, %v368_v51  ;;  %v1623_v62 = vpack.c.bf16 %v378_v55, %v375_v54 }
  0x1d   :  { %1610 = vmatpush1.bf16.msra.mxu1 %v1609_v25  ;;  %v279_v59 = vld [vmem:[%s3244_s3 + $0x188] sm:$0xff]  ;;  %v374_v63 = vld [vmem:[%s3244_s3 + $0x480] sm:$0xff]  ;;  %v377_v0 = vld [vmem:[%s3244_s3 + $0x498] sm:$0xff]  ;;  %v1557_v1 = vpack.c.bf16 %v275_v58, %v272_v57 }
  0x1e   :  { %1538 = vmatpush1.bf16.msra.mxu0 %v1537_v5  ;;  %1612 = vmatprep.subr.bf16.mxu1 %v1611_v26  ;;  %v1559_v2 = vpack.c.bf16 %v282_v60, %v279_v59  ;;  %v278_v4 = vld [vmem:[%s3244_s3 + $0x180] sm:$0xff]  ;;  %v281_v5 = vld [vmem:[%s3244_s3 + $0x198] sm:$0xff]  ;;  %v288_v7 = vld [vmem:[%s3244_s3 + $0x1d0] sm:$0xff] }
  0x1f   :  { %1540 = vmatprep.subr.bf16.mxu0 %v1539_v8  ;;  %v285_v6 = vld [vmem:[%s3244_s3 + $0x1b8] sm:$0xff]  ;;  %v1625_v8 = vpack.c.bf16 %v377_v0, %v374_v63  ;;  %v1561_v9 = vpack.c.bf16 %v281_v5, %v278_v4  ;;  %v284_v11 = vld [vmem:[%s3244_s3 + $0x1b0] sm:$0xff]  ;;  %v287_v12 = vld [vmem:[%s3244_s3 + $0x1c8] sm:$0xff] }
  0x20   :  { %v1563_v10 = vpack.c.bf16 %v288_v7, %v285_v6  ;;  %v291_v13 = vld [vmem:[%s3244_s3 + $0x1e8] sm:$0xff]  ;;  %v294_v14 = vld [vmem:[%s3244_s3 + $0x200] sm:$0xff]  ;;  %v1565_v15 = vpack.c.bf16 %v287_v12, %v284_v11  ;;  %v293_v18 = vld [vmem:[%s3244_s3 + $0x1f8] sm:$0xff] }
  0x21   :  { %1614 = vmatpush1.bf16.msra.mxu1 %v1613_v37  ;;  %v1567_v16 = vpack.c.bf16 %v294_v14, %v291_v13  ;;  %v297_v19 = vld [vmem:[%s3244_s3 + $0x218] sm:$0xff]  ;;  %v296_v23 = vld [vmem:[%s3244_s3 + $0x210] sm:$0xff]  ;;  %v299_v24 = vld [vmem:[%s3244_s3 + $0x228] sm:$0xff] }
  0x22   :  { %1542 = vmatpush1.bf16.msra.mxu0 %v1541_v17  ;;  %1616 = vmatprep.subr.bf16.mxu1 %v1615_v38  ;;  %v290_v17 = vld [vmem:[%s3244_s3 + $0x1e0] sm:$0xff]  ;;  %v303_v25 = vld [vmem:[%s3244_s3 + $0x248] sm:$0xff]  ;;  %v1573_v27 = vpack.c.bf16 %v299_v24, %v296_v23  ;;  %v305_v30 = vld [vmem:[%s3244_s3 + $0x258] sm:$0xff] }
  0x23   :  { %1544 = vmatprep.subr.bf16.mxu0 %v1543_v20  ;;  %v300_v20 = vld [vmem:[%s3244_s3 + $0x230] sm:$0xff]  ;;  %v1569_v21 = vpack.c.bf16 %v293_v18, %v290_v17  ;;  %v306_v26 = vld [vmem:[%s3244_s3 + $0x260] sm:$0xff]  ;;  %v309_v31 = vld [vmem:[%s3244_s3 + $0x278] sm:$0xff] }
  0x24   :  { %v1571_v22 = vpack.c.bf16 %v300_v20, %v297_v19  ;;  %v1575_v28 = vpack.c.bf16 %v306_v26, %v303_v25  ;;  %v308_v35 = vld [vmem:[%s3244_s3 + $0x270] sm:$0xff]  ;;  %v311_v36 = vld [vmem:[%s3244_s3 + $0x288] sm:$0xff]  ;;  %v318_v38 = vld [vmem:[%s3244_s3 + $0x2c0] sm:$0xff] }
  0x25   :  { %1618 = vmatpush1.bf16.msra.mxu1 %v1617_v49  ;;  %v315_v37 = vld [vmem:[%s3244_s3 + $0x2a8] sm:$0xff]  ;;  %v1581_v39 = vpack.c.bf16 %v311_v36, %v308_v35  ;;  %v317_v42 = vld [vmem:[%s3244_s3 + $0x2b8] sm:$0xff]  ;;  %v384_v45 = vld [vmem:[%s3244_s3 + $0x4d0] sm:$0xff] }
  0x26   :  { %1546 = vmatpush1.bf16.msra.mxu0 %v1545_v29  ;;  %1620 = vmatprep.subr.bf16.mxu1 %v1619_v50  ;;  %v302_v29 = vld [vmem:[%s3244_s3 + $0x240] sm:$0xff]  ;;  %v1583_v40 = vpack.c.bf16 %v318_v38, %v315_v37  ;;  %v321_v47 = vld [vmem:[%s3244_s3 + $0x2d8] sm:$0xff]  ;;  %v324_v48 = vld [vmem:[%s3244_s3 + $0x2f0] sm:$0xff] }
  0x27   :  { %1548 = vmatprep.subr.bf16.mxu0 %v1547_v32  ;;  %v312_v32 = vld [vmem:[%s3244_s3 + $0x290] sm:$0xff]  ;;  %v1577_v33 = vpack.c.bf16 %v305_v30, %v302_v29  ;;  %v1587_v50 = vpack.c.bf16 %v324_v48, %v321_v47  ;;  %v383_v51 = vld [vmem:[%s3244_s3 + $0x4c8] sm:$0xff]  ;;  %v390_v57 = vld [vmem:[%s3244_s3 + $0x500] sm:$0xff] }
  0x28   :  { %v1579_v34 = vpack.c.bf16 %v312_v32, %v309_v31  ;;  %v380_v49 = vld [vmem:[%s3244_s3 + $0x4b0] sm:$0xff]  ;;  %v386_v59 = vld [vmem:[%s3244_s3 + $0x4e0] sm:$0xff]  ;;  %v389_v60 = vld [vmem:[%s3244_s3 + $0x4f8] sm:$0xff] }
  0x29   :  { %1622 = vmatpush1.bf16.msra.mxu1 %v1621_v61  ;;  %v320_v52 = vld [vmem:[%s3244_s3 + $0x2d0] sm:$0xff]  ;;  %v1629_v54 = vpack.c.bf16 %v383_v51, %v380_v49  ;;  %v1633_v61 = vpack.c.bf16 %v389_v60, %v386_v59  ;;  %v283_v6 = vld [vmem:[%s3244_s3 + $0x1a8] sm:$0xff]  ;;  %v41_v11 = vld [vmem:[%s3245_s2] sm:$0xf] }
  0x2a   :  { %1550 = vmatpush1.bf16.msra.mxu0 %v1549_v41  ;;  %1624 = vmatprep.subr.bf16.mxu1 %v1623_v62  ;;  %v314_v41 = vld [vmem:[%s3244_s3 + $0x2a0] sm:$0xff]  ;;  %v393_v62 = vld [vmem:[%s3244_s3 + $0x518] sm:$0xff]  ;;  %v396_v63 = vld [vmem:[%s3244_s3 + $0x530] sm:$0xff] }
  0x2b   :  { %1552 = vmatprep.subr.bf16.mxu0 %v1551_v44  ;;  %v1585_v43 = vpack.c.bf16 %v317_v42, %v314_v41  ;;  %v381_v44 = vld [vmem:[%s3244_s3 + $0x4b8] sm:$0xff]  ;;  %v1635_v0 = vpack.c.bf16 %v396_v63, %v393_v62  ;;  %v280_v5 = vld [vmem:[%s3244_s3 + $0x190] sm:$0xff]  ;;  %v709_v23 = vld [vmem:[%s3246_s5 + $0x28] sm:$0xff] }
  0x2c   :  { %v1627_v46 = vpack.c.bf16 %v384_v45, %v381_v44  ;;  %v1639_v7 = vpack.c.bf16 %v283_v6, %v280_v5  ;;  %v754_v14 = vld [vmem:[%s3246_s5 + $0x190] sm:$0xff]  ;;  %v760_v26 = vld [vmem:[%s3246_s5 + $0x1c0] sm:$0xff]  ;;  %v769_v37 = vld [vmem:[%s3246_s5 + $0x208] sm:$0xff] }
  0x2d   :  { %1626 = vmatpush1.bf16.msra.mxu1 %v1625_v8  ;;  %v59_v8 = vlaneseq  ;;  %v766_v36 = vld [vmem:[%s3246_s5 + $0x1f0] sm:$0xff]  ;;  %v286_v44 = vld [vmem:[%s3244_s3 + $0x1c0] sm:$0xff]  ;;  %v289_v47 = vld [vmem:[%s3244_s3 + $0x1d8] sm:$0xff] }
  0x2e   :  { %1554 = vmatpush1.bf16.msra.mxu0 %v1553_v53  ;;  %v323_v53 = vld [vmem:[%s3244_s3 + $0x2e8] sm:$0xff]  ;;  %1628 = vmatprep.subr.bf16.mxu1 %v1627_v46  ;;  %v232_v42 = vld [vmem:[%s3244_s3 + $0x10] sm:$0xff]  ;;  %v1795_v45 = vpack.c.bf16 %v769_v37, %v766_v36  ;;  %v775_v51 = vld [vmem:[%s3246_s5 + $0x238] sm:$0xff] }
  0x2f   :  { %1556 = vmatprep.subr.bf16.mxu0 %v1555_v56  ;;  %v1589_v55 = vpack.c.bf16 %v323_v53, %v320_v52  ;;  %v387_v56 = vld [vmem:[%s3244_s3 + $0x4e8] sm:$0xff]  ;;  %v718_v48 = vld [vmem:[%s3246_s5 + $0x70] sm:$0xff]  ;;  %v724_v62 = vld [vmem:[%s3246_s5 + $0xa0] sm:$0xff] }
  0x30   :  { %v1631_v58 = vpack.c.bf16 %v390_v57, %v387_v56  ;;  %v721_v49 = vld [vmem:[%s3246_s5 + $0x88] sm:$0xff]  ;;  %v238_v56 = vld [vmem:[%s3244_s3 + $0x40] sm:$0xff]  ;;  %v241_v57 = vld [vmem:[%s3244_s3 + $0x58] sm:$0xff] }
  0x31   :  { %1630 = vmatpush1.bf16.msra.mxu1 %v1629_v54  ;;  %v1797_v59 = vpack.c.bf16 %v721_v49, %v718_v48  ;;  %v295_v60 = vld [vmem:[%s3244_s3 + $0x208] sm:$0xff]  ;;  %v727_v63 = vld [vmem:[%s3246_s5 + $0xb8] sm:$0xff]  ;;  %v244_v5 = vld [vmem:[%s3244_s3 + $0x70] sm:$0xff] }
  0x32   :  { %1558 = vmatpush1.bf16.msra.mxu0 %v1557_v1  ;;  %1632 = vmatprep.subr.bf16.mxu1 %v1631_v58  ;;  %v392_v1 = vld [vmem:[%s3244_s3 + $0x510] sm:$0xff]  ;;  %v247_v6 = vld [vmem:[%s3244_s3 + $0x88] sm:$0xff] }
  0x33   :  { %1560 = vmatprep.subr.bf16.mxu0 %v1559_v2  ;;  %v395_v2 = vld [vmem:[%s3244_s3 + $0x528] sm:$0xff]  ;;  %v292_v58 = vld [vmem:[%s3244_s3 + $0x1f0] sm:$0xff] }
  0x34   :  { %v1637_v4 = vpack.c.bf16 %v395_v2, %v392_v1  ;;  %v781_v1 = vld [vmem:[%s3246_s5 + $0x268] sm:$0xff]  ;;  %v1645_v2 = vpack.c.bf16 %v241_v57, %v238_v56  ;;  %v268_v36 = vld [vmem:[%s3244_s3 + $0x130] sm:$0xff] }
  0x35   :  { %1634 = vmatpush1.bf16.msra.mxu1 %v1633_v61  ;;  %v271_v37 = vld [vmem:[%s3244_s3 + $0x148] sm:$0xff]  ;;  %v340_v56 = vld [vmem:[%s3244_s3 + $0x370] sm:$0xff] }
  0x36   :  { %1562 = vmatpush1.bf16.msra.mxu0 %v1561_v9  ;;  %1636 = vmatprep.subr.bf16.mxu1 %v1635_v0  ;;  %v60_v9 = vshrl.u32 %v59_v8, 7  ;;  %v778_v0 = vld [vmem:[%s3246_s5 + $0x250] sm:$0xff]  ;;  %v298_v8 = vld [vmem:[%s3244_s3 + $0x220] sm:$0xff]  ;;  %v331_v48 = vld [vmem:[%s3244_s3 + $0x328] sm:$0xff] }
  0x37   :  { %1564 = vmatprep.subr.bf16.mxu0 %v1563_v10  ;;  %v343_v57 = vld [vmem:[%s3244_s3 + $0x388] sm:$0xff] }
  0x38   :  { %v2390_v10 = vsub.s32 0, %v60_v9  ;;  %v2395_v12 = vsub.s32 1, %v60_v9  ;;  %v73_v25 = vsub.s32 3, %v60_v9 }
  0x39   :  { %1638 = vmatpush1.bf16.msra.mxu1 %v1637_v4  ;;  %v1647_v4 = vpack.c.bf16 %v295_v60, %v292_v58  ;;  %v1678_v58 = vpack.c.bf16 %v343_v57, %v340_v56  ;;  %v716_v57 = vld [vmem:[%s3246_s5 + $0x60] sm:$0xff] }
  0x3a   :  { %1566 = vmatpush1.bf16.msra.mxu0 %v1565_v15  ;;  %1640 = vmatprep.subr.bf16.mxu1 %v1639_v7  ;;  %v62_v13 = vrot.slane %v41_v11, %v2390_v10  ;;  %v757_v15 = vld [vmem:[%s3246_s5 + $0x1a8] sm:$0xff]  ;;  %v74_v35 = vrot.slane %v41_v11, %v73_v25  ;;  %v1801_v7 = vpack.c.bf16 %v727_v63, %v724_v62  ;;  %v310_v25 = vld [vmem:[%s3244_s3 + $0x280] sm:$0xff]  ;;  %v361_v62 = vld [vmem:[%s3244_s3 + $0x418] sm:$0xff] }
  0x3b   :  { %1568 = vmatprep.subr.bf16.mxu0 %v1567_v16  ;;  %v66_v16 = vrot.slane %v41_v11, %v2395_v12  ;;  %v1787_v17 = vpack.c.bf16 %v757_v15, %v754_v14  ;;  %v250_v15 = vld [vmem:[%s3244_s3 + $0xa0] sm:$0xff] }
  0x3e   :  { %1570 = vmatpush1.bf16.msra.mxu0 %v1569_v21  ;;  %v2407_v21 = vsub.s32 2, %v60_v9  ;;  %v301_v9 = vld [vmem:[%s3244_s3 + $0x238] sm:$0xff] }
  0x3f   :  { %1572 = vmatprep.subr.bf16.mxu0 %v1571_v22  ;;  %v706_v22 = vld [vmem:[%s3246_s5 + $0x10] sm:$0xff]  ;;  %v1651_v14 = vpack.c.bf16 %v301_v9, %v298_v8  ;;  %v379_v8 = vld [vmem:[%s3244_s3 + $0x4a8] sm:$0xff] }
  0x40   :  { %v1789_v30 = vpack.c.bf16 %v709_v23, %v706_v22  ;;  %v70_v31 = vrot.slane %v41_v11, %v2407_v21  ;;  %v1803_v11 = vpack.c.bf16 %v781_v1, %v778_v0  ;;  %v256_v23 = vld [vmem:[%s3244_s3 + $0xd0] sm:$0xff]  ;;  %v367_v1 = vld [vmem:[%s3244_s3 + $0x448] sm:$0xff] }
  0x41   :  { %v364_v0 = vld [vmem:[%s3244_s3 + $0x430] sm:$0xff] }
  0x42   :  { %1574 = vmatpush1.bf16.msra.mxu0 %v1573_v27  ;;  %v763_v27 = vld [vmem:[%s3246_s5 + $0x1d8] sm:$0xff] }
  0x43   :  { %1576 = vmatprep.subr.bf16.mxu0 %v1575_v28  ;;  %v1791_v32 = vpack.c.bf16 %v763_v27, %v760_v26  ;;  %v313_v26 = vld [vmem:[%s3244_s3 + $0x298] sm:$0xff] }
  0x46   :  { %1578 = vmatpush1.bf16.msra.mxu0 %v1577_v33  ;;  %v712_v33 = vld [vmem:[%s3246_s5 + $0x40] sm:$0xff] }
  0x47   :  { %1580 = vmatprep.subr.bf16.mxu0 %v1579_v34  ;;  %v715_v34 = vld [vmem:[%s3246_s5 + $0x58] sm:$0xff] }
  0x4a   :  { %1582 = vmatpush1.bf16.msra.mxu0 %v1581_v39  ;;  %v1793_v39 = vpack.c.bf16 %v715_v34, %v712_v33  ;;  %v319_v33 = vld [vmem:[%s3244_s3 + $0x2c8] sm:$0xff] }
  0x4b   :  { %1584 = vmatprep.subr.bf16.mxu0 %v1583_v40 }
  0x4e   :  { %1586 = vmatpush1.bf16.msra.mxu0 %v1585_v43  ;;  %v235_v43 = vld [vmem:[%s3244_s3 + $0x28] sm:$0xff] }
  0x4f   :  { %1588 = vmatprep.subr.bf16.mxu0 %v1587_v50  ;;  %v772_v50 = vld [vmem:[%s3246_s5 + $0x220] sm:$0xff]  ;;  %v1641_v53 = vpack.c.bf16 %v235_v43, %v232_v42 }
  0x50   :  { %v1799_v61 = vpack.c.bf16 %v775_v51, %v772_v50  ;;  %v274_v43 = vld [vmem:[%s3244_s3 + $0x160] sm:$0xff]  ;;  %v1931_v50 = vmov 0.0|0.0  }
  0x51   :  { %v334_v51 = vld [vmem:[%s3244_s3 + $0x340] sm:$0xff] }
  0x52   :  { %1590 = vmatpush1.bf16.msra.mxu0 %v1589_v55  ;;  %v1643_v55 = vpack.c.bf16 %v289_v47, %v286_v44  ;;  %v277_v44 = vld [vmem:[%s3244_s3 + $0x178] sm:$0xff]  ;;  %v328_v47 = vld [vmem:[%s3244_s3 + $0x310] sm:$0xff] }
  0x53   :  { %1788 = vmatprep.subr.bf16.mxu0 %v1787_v17  ;;  %v304_v17 = vld [vmem:[%s3244_s3 + $0x250] sm:$0xff]  ;;  %v1672_v49 = vpack.c.bf16 %v331_v48, %v328_v47 }
  0x54   :  { %v790_v48 = vld [vmem:[%s3246_s5 + $0x2b0] sm:$0xff] }
  0xe0   :  { %v149_v18 = vpop.f32.mrb[0].mxu0 }
  0xe1   :  { %v2405_v19 = vadd.f32 %v149_v18, %v62_v13  ;;  %v151_v20 = vpop.f32.mrb[1].mxu0  ;;  %v1649_v13 = vpack.c.bf16 %v247_v6, %v244_v5  ;;  %v307_v18 = vld [vmem:[%s3244_s3 + $0x268] sm:$0xff]  ;;  %v373_v5 = vld [vmem:[%s3244_s3 + $0x478] sm:$0xff] }
  0xe2   :  { %v152_v24 = vadd.f32 %v151_v20, %v66_v16  ;;  %v253_v16 = vld [vmem:[%s3244_s3 + $0xb8] sm:$0xff]  ;;  %v1655_v22 = vpack.c.bf16 %v307_v18, %v304_v17  ;;  %v394_v18 = vld [vmem:[%s3244_s3 + $0x520] sm:$0xff] }
  0xe3   :  { %v225_v28 = vmax.f32 %v2405_v19, 0.0  ;;  %v1653_v20 = vpack.c.bf16 %v253_v16, %v250_v15  ;;  %v346_v19 = vld [vmem:[%s3244_s3 + $0x3a0] sm:$0xff]  ;;  %v388_v15 = vld [vmem:[%s3244_s3 + $0x4f0] sm:$0xff]  ;;  %v391_v16 = vld [vmem:[%s3244_s3 + $0x508] sm:$0xff] }
  0xe4   :  { %v226_v29 = vmax.f32 %v152_v24, 0.0  ;;  %v259_v24 = vld [vmem:[%s3244_s3 + $0xe8] sm:$0xff]  ;;  %v1702_v17 = vpack.c.bf16 %v391_v16, %v388_v15  ;;  %v734_v16 = vld [vmem:[%s3246_s5 + $0xf0] sm:$0xff] }
  0xe5   :  { %v1657_v27 = vpack.c.bf16 %v259_v24, %v256_v23  ;;  %v708_v23 = vld [vmem:[%s3246_s5 + $0x20] sm:$0xff] }
  0xe6   :  { %482 = vmatprep.mubr.f32.mxu0 %v226_v29 }
  0xe7   :  { %483 = vmatmul.mubr.f32.vlgmr.msra.gmra.mrb[4].mxu0 %v225_v28 }
  0xe8   :  { %v220_v38 = vpop.f32.mrb[2].mxu0  ;;  %1790 = vmatpush3.bf16.msra.mxu0 %v1789_v30  ;;  %v262_v30 = vld [vmem:[%s3244_s3 + $0x100] sm:$0xff] }
  0xe9   :  { %v2437_v40 = vadd.f32 %v220_v38, %v70_v31  ;;  %v222_v41 = vpop.f32.mrb[3].mxu0  ;;  %1792 = vmatprep.subr.bf16.mxu0 %v1791_v32  ;;  %v265_v31 = vld [vmem:[%s3244_s3 + $0x118] sm:$0xff]  ;;  %v316_v32 = vld [vmem:[%s3244_s3 + $0x2b0] sm:$0xff]  ;;  %v322_v38 = vld [vmem:[%s3244_s3 + $0x2e0] sm:$0xff] }
  0xea   :  { %v2448_v46 = vadd.f32 %v222_v41, %v74_v35  ;;  %v1661_v34 = vpack.c.bf16 %v265_v31, %v262_v30  ;;  %v1663_v35 = vpack.c.bf16 %v319_v33, %v316_v32  ;;  %v1665_v41 = vpack.c.bf16 %v271_v37, %v268_v36  ;;  %v733_v30 = vld [vmem:[%s3246_s5 + $0xe8] sm:$0xff]  ;;  %v711_v31 = vld [vmem:[%s3246_s5 + $0x38] sm:$0xff]  ;;  %v714_v32 = vld [vmem:[%s3246_s5 + $0x50] sm:$0xff] }
  0xeb   :  { %v227_v54 = vmax.f32 %v2437_v40, 0.0  ;;  %v710_v36 = vld [vmem:[%s3246_s5 + $0x30] sm:$0xff]  ;;  %v713_v37 = vld [vmem:[%s3246_s5 + $0x48] sm:$0xff]  ;;  %v719_v40 = vld [vmem:[%s3246_s5 + $0x78] sm:$0xff] }
  0xec   :  { %v228_v52 = vmax.f32 %v2448_v46, 0.0  ;;  %1794 = vmatpush3.bf16.msra.mxu0 %v1793_v39  ;;  %v325_v39 = vld [vmem:[%s3244_s3 + $0x2f8] sm:$0xff] }
  0xed   :  { %1796 = vmatprep.subr.bf16.mxu0 %v1795_v45  ;;  %v1667_v42 = vpack.c.bf16 %v325_v39, %v322_v38  ;;  %v1669_v45 = vpack.c.bf16 %v277_v44, %v274_v43  ;;  %v787_v38 = vld [vmem:[%s3246_s5 + $0x298] sm:$0xff]  ;;  %v1711_v39 = vpack.c.bf16 %v714_v32, %v711_v31  ;;  %v736_v43 = vld [vmem:[%s3246_s5 + $0x100] sm:$0xff]  ;;  %v746_v31 = vld [vmem:[%s3246_s5 + $0x150] sm:$0xff] }
  0xee   :  { %1406 = vmatprep.mubr.msk.f32.mxu1 %vm414_vm1, %v228_v52  ;;  %v739_v44 = vld [vmem:[%s3246_s5 + $0x118] sm:$0xff]  ;;  %v749_v32 = vld [vmem:[%s3246_s5 + $0x168] sm:$0xff] }
  0xef   :  { %554 = vmatmul.mubr.f32.vlgmr.msra.gmra.mrb[0].mxu1 %v227_v54  ;;  %v1809_v47 = vpack.c.bf16 %v739_v44, %v736_v43  ;;  %v758_v44 = vld [vmem:[%s3246_s5 + $0x1b0] sm:$0xff] }
  0xf0   :  { %1642 = vmatpush3.bf16.msra.mxu1 %v1641_v53  ;;  %624 = vmatprep.mubr.f32.mxu1 %v226_v29  ;;  %v1659_v29 = vpack.c.bf16 %v313_v26, %v310_v25  ;;  %v337_v53 = vld [vmem:[%s3244_s3 + $0x358] sm:$0xff]  ;;  %v730_v25 = vld [vmem:[%s3246_s5 + $0xd0] sm:$0xff] }
  0xf1   :  { %1644 = vmatprep.subr.bf16.mxu1 %v1643_v55  ;;  %1798 = vmatpush3.bf16.msra.mxu0 %v1797_v59  ;;  %v1675_v55 = vpack.c.bf16 %v337_v53, %v334_v51  ;;  %v355_v59 = vld [vmem:[%s3244_s3 + $0x3e8] sm:$0xff]  ;;  %v1805_v33 = vpack.c.bf16 %v733_v30, %v730_v25  ;;  %v1713_v53 = vpack.c.bf16 %v713_v37, %v710_v36  ;;  %v743_v25 = vld [vmem:[%s3246_s5 + $0x138] sm:$0xff]  ;;  %v752_v37 = vld [vmem:[%s3246_s5 + $0x180] sm:$0xff] }
  0xf2   :  { %1800 = vmatprep.subr.bf16.mxu0 %v1799_v61  ;;  %v358_v61 = vld [vmem:[%s3244_s3 + $0x400] sm:$0xff] }
  0xf3   :  { %v1687_v63 = vpack.c.bf16 %v361_v62, %v358_v61  ;;  %v725_v62 = vld [vmem:[%s3246_s5 + $0xa8] sm:$0xff] }
  0xf4   :  { %1646 = vmatpush3.bf16.msra.mxu1 %v1645_v2  ;;  %v1690_v2 = vpack.c.bf16 %v367_v1, %v364_v0  ;;  %v748_v0 = vld [vmem:[%s3246_s5 + $0x160] sm:$0xff]  ;;  %v751_v1 = vld [vmem:[%s3246_s5 + $0x178] sm:$0xff] }
  0xf5   :  { %1648 = vmatprep.subr.bf16.mxu1 %v1647_v4  ;;  %1802 = vmatpush3.bf16.msra.mxu0 %v1801_v7  ;;  %v370_v4 = vld [vmem:[%s3244_s3 + $0x460] sm:$0xff]  ;;  %v376_v7 = vld [vmem:[%s3244_s3 + $0x490] sm:$0xff] }
  0xf6   :  { %1804 = vmatprep.subr.bf16.mxu0 %v1803_v11  ;;  %v1693_v6 = vpack.c.bf16 %v373_v5, %v370_v4  ;;  %v1696_v9 = vpack.c.bf16 %v379_v8, %v376_v7  ;;  %v382_v11 = vld [vmem:[%s3244_s3 + $0x4c0] sm:$0xff]  ;;  %v1817_v5 = vpack.c.bf16 %v751_v1, %v748_v0 }
  0xf7   :  { %v732_v4 = vld [vmem:[%s3246_s5 + $0xe0] sm:$0xff] }
  0xf8   :  { %1650 = vmatpush3.bf16.msra.mxu1 %v1649_v13  ;;  %v385_v13 = vld [vmem:[%s3244_s3 + $0x4d8] sm:$0xff]  ;;  %v728_v8 = vld [vmem:[%s3246_s5 + $0xc0] sm:$0xff] }
  0xf9   :  { %1652 = vmatprep.subr.bf16.mxu1 %v1651_v14  ;;  %v1699_v14 = vpack.c.bf16 %v385_v13, %v382_v11  ;;  %1806 = vmatpush3.bf16.msra.mxu0 %v1805_v33  ;;  %v735_v11 = vld [vmem:[%s3246_s5 + $0xf8] sm:$0xff]  ;;  %v738_v13 = vld [vmem:[%s3246_s5 + $0x110] sm:$0xff]  ;;  %v753_v33 = vld [vmem:[%s3246_s5 + $0x188] sm:$0xff] }
  0xfa   :  { %v1727_v15 = vpack.c.bf16 %v738_v13, %v735_v11  ;;  %v791_v11 = vld [vmem:[%s3246_s5 + $0x2b8] sm:$0xff] }
  0xfb   :  { %v795_v13 = vld [vmem:[%s3246_s5 + $0x2d8] sm:$0xff] }
  0xfc   :  { %1654 = vmatpush3.bf16.msra.mxu1 %v1653_v20  ;;  %v397_v20 = vld [vmem:[%s3244_s3 + $0x538] sm:$0xff] }
  0xfd   :  { %1656 = vmatprep.subr.bf16.mxu1 %v1655_v22  ;;  %v705_v22 = vld [vmem:[%s3246_s5 + $0x8] sm:$0xff]  ;;  %v1705_v24 = vpack.c.bf16 %v397_v20, %v394_v18  ;;  %v744_v20 = vld [vmem:[%s3246_s5 + $0x140] sm:$0xff] }
  0xfe   :  { %v1707_v26 = vpack.c.bf16 %v708_v23, %v705_v22  ;;  %v741_v18 = vld [vmem:[%s3246_s5 + $0x128] sm:$0xff] }
  0xff   :  { %v1731_v23 = vpack.c.bf16 %v744_v20, %v741_v18  ;;  %v797_v18 = vld [vmem:[%s3246_s5 + $0x2e8] sm:$0xff] }
 0x100   :  { %1658 = vmatpush3.bf16.msra.mxu1 %v1657_v27  ;;  %v704_v27 = vld [vmem:[%s3246_s5] sm:$0xff]  ;;  %v801_v20 = vld [vmem:[%s3246_s5 + $0x308] sm:$0xff] }
 0x101   :  { %1660 = vmatprep.subr.bf16.mxu1 %v1659_v29  ;;  %v707_v29 = vld [vmem:[%s3246_s5 + $0x18] sm:$0xff] }
 0x104   :  { %1662 = vmatpush3.bf16.msra.mxu1 %v1661_v34  ;;  %v784_v34 = vld [vmem:[%s3246_s5 + $0x280] sm:$0xff] }
 0x105   :  { %1664 = vmatprep.subr.bf16.mxu1 %v1663_v35  ;;  %v1709_v35 = vpack.c.bf16 %v707_v29, %v704_v27  ;;  %v750_v27 = vld [vmem:[%s3246_s5 + $0x170] sm:$0xff] }
 0x108   :  { %1666 = vmatpush3.bf16.msra.mxu1 %v1665_v41  ;;  %v717_v41 = vld [vmem:[%s3246_s5 + $0x68] sm:$0xff] }
 0x109   :  { %1668 = vmatprep.subr.bf16.mxu1 %v1667_v42  ;;  %v1807_v42 = vpack.c.bf16 %v787_v38, %v784_v34  ;;  %v756_v34 = vld [vmem:[%s3246_s5 + $0x1a0] sm:$0xff]  ;;  %v755_v38 = vld [vmem:[%s3246_s5 + $0x198] sm:$0xff] }
 0x10a   :  { %v1739_v36 = vpack.c.bf16 %v756_v34, %v753_v33  ;;  %v800_v34 = vld [vmem:[%s3246_s5 + $0x300] sm:$0xff] }
 0x10b   :  { %1808 = vmatprep.subr.bf16.mxu0 %v1807_v42  ;;  %v1741_v42 = vpack.c.bf16 %v755_v38, %v752_v37  ;;  %v803_v37 = vld [vmem:[%s3246_s5 + $0x318] sm:$0xff]  ;;  %v802_v38 = vld [vmem:[%s3246_s5 + $0x310] sm:$0xff] }
 0x10c   :  { %1670 = vmatpush3.bf16.msra.mxu1 %v1669_v45  ;;  %v720_v45 = vld [vmem:[%s3246_s5 + $0x80] sm:$0xff]  ;;  %1810 = vmatpush3.bf16.msra.mxu0 %v1809_v47  ;;  %v765_v47 = vld [vmem:[%s3246_s5 + $0x1e8] sm:$0xff] }
 0x10d   :  { %1671 = vmatprep.subr.bf16.mxu1 %v1931_v50  ;;  %v1715_v56 = vpack.c.bf16 %v720_v45, %v717_v41  ;;  %v762_v41 = vld [vmem:[%s3246_s5 + $0x1d0] sm:$0xff]  ;;  %v761_v45 = vld [vmem:[%s3246_s5 + $0x1c8] sm:$0xff] }
 0x10f   :  { %625 = vmatmul.mubr.f32.vlgmr.msra.gmra.mrb[2].mxu1 %v225_v28  ;;  %v349_v28 = vld [vmem:[%s3244_s3 + $0x3b8] sm:$0xff] }
 0x110   :  { %1673 = vmatpush1.bf16.msra.mxu1 %v1672_v49  ;;  %1407 = vmatprep.mubr.msk.f32.mxu1 %vm414_vm1, %v228_v52  ;;  %v1681_v46 = vpack.c.bf16 %v349_v28, %v346_v19  ;;  %v352_v52 = vld [vmem:[%s3244_s3 + $0x3d0] sm:$0xff]  ;;  %v793_v49 = vld [vmem:[%s3246_s5 + $0x2c8] sm:$0xff] }
 0x111   :  { %1674 = vmatprep.subr.bf16.mxu1 %v1931_v50  ;;  %v1684_v60 = vpack.c.bf16 %v355_v59, %v352_v52  ;;  %v1811_v51 = vpack.c.bf16 %v793_v49, %v790_v48  ;;  %v726_v19 = vld [vmem:[%s3246_s5 + $0xb0] sm:$0xff]  ;;  %v1717_v52 = vpack.c.bf16 %v719_v40, %v716_v57  ;;  %v768_v48 = vld [vmem:[%s3246_s5 + $0x200] sm:$0xff]  ;;  %v1745_v49 = vpack.c.bf16 %v761_v45, %v758_v44 }
 0x112   :  { %v722_v59 = vld [vmem:[%s3246_s5 + $0x90] sm:$0xff]  ;;  %v1773_v45 = vpack.c.bf16 %v803_v37, %v800_v34 }
 0x113   :  { %1812 = vmatprep.subr.bf16.mxu0 %v1811_v51  ;;  %v1747_v51 = vpack.c.bf16 %v768_v48, %v765_v47  ;;  %v774_v57 = vld [vmem:[%s3246_s5 + $0x230] sm:$0xff] }
 0x114   :  { %1676 = vmatpush1.bf16.msra.mxu1 %v1675_v55  ;;  %v742_v55 = vld [vmem:[%s3246_s5 + $0x130] sm:$0xff] }
 0x115   :  { %1677 = vmatprep.subr.bf16.mxu1 %v1931_v50  ;;  %v806_v48 = vld [vmem:[%s3246_s5 + $0x330] sm:$0xff] }
 0x116   :  { %v1139_v37 = vld [vmem:[%s3248_s7 + $0x50] sm:$0xff] }
 0x118   :  { %1679 = vmatpush1.bf16.msra.mxu1 %v1678_v58  ;;  %v723_v58 = vld [vmem:[%s3246_s5 + $0x98] sm:$0xff] }
 0x119   :  { %1680 = vmatprep.subr.bf16.mxu1 %v1931_v50  ;;  %v1719_v61 = vpack.c.bf16 %v726_v19, %v723_v58  ;;  %v770_v58 = vld [vmem:[%s3246_s5 + $0x210] sm:$0xff]  ;;  %v773_v19 = vld [vmem:[%s3246_s5 + $0x228] sm:$0xff] }
 0x11c   :  { %1682 = vmatpush1.bf16.msra.mxu1 %v1681_v46  ;;  %v796_v46 = vld [vmem:[%s3246_s5 + $0x2e0] sm:$0xff] }
 0x11d   :  { %1683 = vmatprep.subr.bf16.mxu1 %v1931_v50 }
 0x120   :  { %1685 = vmatpush1.bf16.msra.mxu1 %v1684_v60  ;;  %v799_v60 = vld [vmem:[%s3246_s5 + $0x2f8] sm:$0xff] }
 0x121   :  { %1686 = vmatprep.subr.bf16.mxu1 %v1931_v50 }
 0x124   :  { %1688 = vmatpush1.bf16.msra.mxu1 %v1687_v63  ;;  %v1815_v63 = vpack.c.bf16 %v799_v60, %v796_v46  ;;  %v780_v46 = vld [vmem:[%s3246_s5 + $0x260] sm:$0xff] }
 0x125   :  { %1689 = vmatprep.subr.bf16.mxu1 %v1931_v50  ;;  %v776_v60 = vld [vmem:[%s3246_s5 + $0x240] sm:$0xff] }
 0x128   :  { %1691 = vmatpush1.bf16.msra.mxu1 %v1690_v2  ;;  %v729_v2 = vld [vmem:[%s3246_s5 + $0xc8] sm:$0xff] }
 0x129   :  { %1692 = vmatprep.subr.bf16.mxu1 %v1931_v50  ;;  %v1723_v7 = vpack.c.bf16 %v732_v4, %v729_v2  ;;  %v782_v2 = vld [vmem:[%s3246_s5 + $0x270] sm:$0xff]  ;;  %v785_v4 = vld [vmem:[%s3246_s5 + $0x288] sm:$0xff] }
 0x12c   :  { %1694 = vmatpush1.bf16.msra.mxu1 %v1693_v6  ;;  %v1721_v6 = vpack.c.bf16 %v725_v62, %v722_v59  ;;  %v783_v62 = vld [vmem:[%s3246_s5 + $0x278] sm:$0xff] }
 0x12d   :  { %1695 = vmatprep.subr.bf16.mxu1 %v1931_v50 }
 0x130   :  { %1697 = vmatpush1.bf16.msra.mxu1 %v1696_v9  ;;  %v731_v9 = vld [vmem:[%s3246_s5 + $0xd8] sm:$0xff] }
 0x131   :  { %1698 = vmatprep.subr.bf16.mxu1 %v1931_v50 }
 0x134   :  { %1700 = vmatpush1.bf16.msra.mxu1 %v1699_v14  ;;  %v1725_v14 = vpack.c.bf16 %v731_v9, %v728_v8  ;;  %v788_v9 = vld [vmem:[%s3246_s5 + $0x2a0] sm:$0xff] }
 0x135   :  { %1701 = vmatprep.subr.bf16.mxu1 %v1931_v50 }
 0x138   :  { %1703 = vmatpush1.bf16.msra.mxu1 %v1702_v17  ;;  %v737_v17 = vld [vmem:[%s3246_s5 + $0x108] sm:$0xff] }
 0x139   :  { %1704 = vmatprep.subr.bf16.mxu1 %v1931_v50  ;;  %v1729_v22 = vpack.c.bf16 %v737_v17, %v734_v16  ;;  %v794_v17 = vld [vmem:[%s3246_s5 + $0x2d0] sm:$0xff] }
 0x13c   :  { %1706 = vmatpush1.bf16.msra.mxu1 %v1705_v24  ;;  %v740_v24 = vld [vmem:[%s3246_s5 + $0x120] sm:$0xff] }
 0x13d   :  { %1708 = vmatprep.subr.bf16.mxu1 %v1707_v26  ;;  %v747_v26 = vld [vmem:[%s3246_s5 + $0x158] sm:$0xff]  ;;  %v1733_v29 = vpack.c.bf16 %v743_v25, %v740_v24  ;;  %v2897_v25 = vld [vmem:[%s3247_s4] sm:$0x7] }
 0x13e   :  { %v1735_v30 = vpack.c.bf16 %v750_v27, %v747_v26 }
 0x13f   :  { %695 = vmatmul.mubr.f32.vlgmr.msra.gmra.mrb[4].mxu1 %v227_v54  ;;  %v745_v54 = vld [vmem:[%s3246_s5 + $0x148] sm:$0xff] }
 0x140   :  { %1710 = vmatpush1.bf16.msra.mxu1 %v1709_v35  ;;  %v1813_v28 = vpack.c.bf16 %v745_v54, %v742_v55  ;;  %v1737_v35 = vpack.c.bf16 %v749_v32, %v746_v31  ;;  %v767_v55 = vld [vmem:[%s3246_s5 + $0x1f8] sm:$0xff] }
 0x141   :  { %1712 = vmatprep.subr.bf16.mxu1 %v1711_v39  ;;  %v759_v39 = vld [vmem:[%s3246_s5 + $0x1b8] sm:$0xff] }
 0x142   :  { %1814 = vmatpush3.bf16.msra.mxu0 %v1813_v28  ;;  %v1743_v43 = vpack.c.bf16 %v762_v41, %v759_v39  ;;  %v777_v28 = vld [vmem:[%s3246_s5 + $0x248] sm:$0xff] }
 0x143   :  { %1816 = vmatprep.subr.bf16.mxu0 %v1815_v63  ;;  %v1755_v59 = vpack.c.bf16 %v780_v46, %v777_v28  ;;  %v786_v63 = vld [vmem:[%s3246_s5 + $0x290] sm:$0xff]  ;;  %v805_v39 = vld [vmem:[%s3246_s5 + $0x328] sm:$0xff]  ;;  %v815_v46 = vld [vmem:[%s3246_s5 + $0x378] sm:$0xff] }
 0x144   :  { %1714 = vmatpush1.bf16.msra.mxu1 %v1713_v53  ;;  %v764_v53 = vld [vmem:[%s3246_s5 + $0x1e0] sm:$0xff]  ;;  %v1759_v1 = vpack.c.bf16 %v786_v63, %v783_v62  ;;  %v1820_v47 = vpack.c.bf16 %v805_v39, %v802_v38  ;;  %v1142_v38 = vld [vmem:[%s3248_s7 + $0x68] sm:$0xff]  ;;  %v1144_v39 = vld [vmem:[%s3248_s7 + $0x78] sm:$0xff] }
 0x145   :  { %1716 = vmatprep.subr.bf16.mxu1 %v1715_v56  ;;  %v771_v56 = vld [vmem:[%s3246_s5 + $0x218] sm:$0xff]  ;;  %v1749_v40 = vpack.c.bf16 %v767_v55, %v764_v53  ;;  %v809_v53 = vld [vmem:[%s3246_s5 + $0x348] sm:$0xff]  ;;  %v808_v55 = vld [vmem:[%s3246_s5 + $0x340] sm:$0xff] }
 0x146   :  { %1818 = vmatpush3.bf16.msra.mxu0 %v1817_v5  ;;  %v1751_v54 = vpack.c.bf16 %v774_v57, %v771_v56  ;;  %v789_v5 = vld [vmem:[%s3246_s5 + $0x2a8] sm:$0xff]  ;;  %v811_v56 = vld [vmem:[%s3246_s5 + $0x358] sm:$0xff] }
 0x147   :  { %1819 = vmatprep.subr.bf16.mxu0 %v1931_v50  ;;  %v813_v57 = vld [vmem:[%s3246_s5 + $0x368] sm:$0xff] }
 0x148   :  { %1718 = vmatpush1.bf16.msra.mxu1 %v1717_v52  ;;  %v1753_v52 = vpack.c.bf16 %v773_v19, %v770_v58  ;;  %v1823_v58 = vpack.c.bf16 %v811_v56, %v808_v55  ;;  %v812_v19 = vld [vmem:[%s3246_s5 + $0x360] sm:$0xff]  ;;  %v1150_v55 = vld [vmem:[%s3248_s7 + $0xa8] sm:$0xff]  ;;  %v1152_v56 = vld [vmem:[%s3248_s7 + $0xb8] sm:$0xff] }
 0x149   :  { %1720 = vmatprep.subr.bf16.mxu1 %v1719_v61  ;;  %v779_v61 = vld [vmem:[%s3246_s5 + $0x258] sm:$0xff]  ;;  %v1781_v62 = vpack.c.bf16 %v815_v46, %v812_v19  ;;  %v1154_v19 = vld [vmem:[%s3248_s7 + $0xc8] sm:$0xff] }
 0x14a   :  { %v1757_v0 = vpack.c.bf16 %v779_v61, %v776_v60  ;;  %v819_v60 = vld [vmem:[%s3246_s5 + $0x398] sm:$0xff]  ;;  %v822_v61 = vld [vmem:[%s3246_s5 + $0x3b0] sm:$0xff] }
 0x14c   :  { %1722 = vmatpush1.bf16.msra.mxu1 %v1721_v6  ;;  %v792_v6 = vld [vmem:[%s3246_s5 + $0x2c0] sm:$0xff] }
 0x14d   :  { %1724 = vmatprep.subr.bf16.mxu1 %v1723_v7  ;;  %v1761_v7 = vpack.c.bf16 %v785_v4, %v782_v2  ;;  %v1763_v8 = vpack.c.bf16 %v792_v6, %v789_v5  ;;  %v821_v2 = vld [vmem:[%s3246_s5 + $0x3a8] sm:$0xff]  ;;  %v820_v4 = vld [vmem:[%s3246_s5 + $0x3a0] sm:$0xff]  ;;  %v823_v5 = vld [vmem:[%s3246_s5 + $0x3b8] sm:$0xff] }
 0x150   :  { %1726 = vmatpush1.bf16.msra.mxu1 %v1725_v14  ;;  %v798_v14 = vld [vmem:[%s3246_s5 + $0x2f0] sm:$0xff] }
 0x151   :  { %1728 = vmatprep.subr.bf16.mxu1 %v1727_v15  ;;  %v1765_v15 = vpack.c.bf16 %v791_v11, %v788_v9  ;;  %v1767_v16 = vpack.c.bf16 %v798_v14, %v795_v13  ;;  %v410_v13 = vrot.slane %v2897_v25, %v2407_v21 }
 0x154   :  { %1730 = vmatpush1.bf16.msra.mxu1 %v1729_v22  ;;  %v804_v22 = vld [vmem:[%s3246_s5 + $0x320] sm:$0xff] }
 0x155   :  { %1732 = vmatprep.subr.bf16.mxu1 %v1731_v23  ;;  %v1769_v23 = vpack.c.bf16 %v797_v18, %v794_v17  ;;  %v1771_v24 = vpack.c.bf16 %v804_v22, %v801_v20  ;;  %v1132_v20 = vld [vmem:[%s3248_s7 + $0x18] sm:$0xff]  ;;  %v1129_v22 = vld [vmem:[%s3248_s7] sm:$0xff] }
 0x158   :  { %1734 = vmatpush1.bf16.msra.mxu1 %v1733_v29  ;;  %v402_v29 = vrot.slane %v2897_v25, %v2390_v10 }
 0x159   :  { %1736 = vmatprep.subr.bf16.mxu1 %v1735_v30  ;;  %v406_v30 = vrot.slane %v2897_v25, %v2395_v12  ;;  %v1134_v25 = vld [vmem:[%s3248_s7 + $0x28] sm:$0xff] }
 0x15c   :  { %1738 = vmatpush1.bf16.msra.mxu1 %v1737_v35 }
 0x15d   :  { %1740 = vmatprep.subr.bf16.mxu1 %v1739_v36 }
 0x160   :  { %1742 = vmatpush1.bf16.msra.mxu1 %v1741_v42  ;;  %v807_v42 = vld [vmem:[%s3246_s5 + $0x338] sm:$0xff] }
 0x161   :  { %1744 = vmatprep.subr.bf16.mxu1 %v1743_v43  ;;  %v810_v43 = vld [vmem:[%s3246_s5 + $0x350] sm:$0xff] }
 0x164   :  { %1746 = vmatpush1.bf16.msra.mxu1 %v1745_v49 }
 0x165   :  { %1748 = vmatprep.subr.bf16.mxu1 %v1747_v51  ;;  %v1775_v51 = vpack.c.bf16 %v810_v43, %v807_v42  ;;  %v1843_v42 = vpack.c.bf16 %v1144_v39, %v1142_v38  ;;  %v1141_v43 = vld [vmem:[%s3248_s7 + $0x60] sm:$0xff]  ;;  %v1182_v38 = vld [vmem:[%s3248_s7 + $0x1a8] sm:$0xff]  ;;  %v1184_v39 = vld [vmem:[%s3248_s7 + $0x1b8] sm:$0xff] }
 0x168   :  { %1750 = vmatpush1.bf16.msra.mxu1 %v1749_v40  ;;  %v816_v40 = vld [vmem:[%s3246_s5 + $0x380] sm:$0xff] }
 0x169   :  { %1752 = vmatprep.subr.bf16.mxu1 %v1751_v54  ;;  %v1777_v54 = vpack.c.bf16 %v809_v53, %v806_v48  ;;  %v1779_v28 = vpack.c.bf16 %v816_v40, %v813_v57  ;;  %v1147_v53 = vld [vmem:[%s3248_s7 + $0x90] sm:$0xff]  ;;  %v1851_v40 = vpack.c.bf16 %v1152_v56, %v1150_v55  ;;  %v1190_v56 = vld [vmem:[%s3248_s7 + $0x1e8] sm:$0xff] }
 0x16c   :  { %1754 = vmatpush1.bf16.msra.mxu1 %v1753_v52  ;;  %v814_v52 = vld [vmem:[%s3246_s5 + $0x370] sm:$0xff] }
 0x16d   :  { %1756 = vmatprep.subr.bf16.mxu1 %v1755_v59  ;;  %v817_v59 = vld [vmem:[%s3246_s5 + $0x388] sm:$0xff] }
 0x16e   :  { %v1826_v63 = vpack.c.bf16 %v817_v59, %v814_v52  ;;  %v1153_v59 = vld [vmem:[%s3248_s7 + $0xc0] sm:$0xff] }
 0x170   :  { %1758 = vmatpush1.bf16.msra.mxu1 %v1757_v0  ;;  %v818_v0 = vld [vmem:[%s3246_s5 + $0x390] sm:$0xff] }
 0x171   :  { %1760 = vmatprep.subr.bf16.mxu1 %v1759_v1  ;;  %v1783_v1 = vpack.c.bf16 %v822_v61, %v819_v60  ;;  %v1785_v6 = vpack.c.bf16 %v821_v2, %v818_v0  ;;  %v1155_v60 = vld [vmem:[%s3248_s7 + $0xd0] sm:$0xff]  ;;  %v1158_v61 = vld [vmem:[%s3248_s7 + $0xe8] sm:$0xff] }
 0x172   :  { %v1159_v2 = vld [vmem:[%s3248_s7 + $0xf0] sm:$0xff] }
 0x174   :  { %1762 = vmatpush1.bf16.msra.mxu1 %v1761_v7  ;;  %v1829_v7 = vpack.c.bf16 %v823_v5, %v820_v4  ;;  %v1162_v4 = vld [vmem:[%s3248_s7 + $0x108] sm:$0xff]  ;;  %v1164_v5 = vld [vmem:[%s3248_s7 + $0x118] sm:$0xff] }
 0x175   :  { %1764 = vmatprep.subr.bf16.mxu1 %v1763_v8 }
 0x178   :  { %1766 = vmatpush1.bf16.msra.mxu1 %v1765_v15 }
 0x179   :  { %1768 = vmatprep.subr.bf16.mxu1 %v1767_v16 }
 0x17c   :  { %1770 = vmatpush1.bf16.msra.mxu1 %v1769_v23 }
 0x17d   :  { %1772 = vmatprep.subr.bf16.mxu1 %v1771_v24  ;;  %v1131_v24 = vld [vmem:[%s3248_s7 + $0x10] sm:$0xff] }
 0x1ba   :  { %v484_v26 = vpop.f32.mrb[4].mxu0 }
 0x1bb   :  { %v486_v27 = vpop.f32.mrb[5].mxu0  ;;  %v485_v31 = vadd.f32 %v484_v26, %v402_v29  ;;  %v1136_v26 = vld [vmem:[%s3248_s7 + $0x38] sm:$0xff] }
 0x1bc   :  { %v487_v32 = vadd.f32 %v486_v27, %v406_v30  ;;  %v1833_v27 = vpack.c.bf16 %v1131_v24, %v1129_v22  ;;  %v1835_v29 = vpack.c.bf16 %v1136_v26, %v1134_v25  ;;  %v1133_v30 = vld [vmem:[%s3248_s7 + $0x20] sm:$0xff]  ;;  %v1171_v24 = vld [vmem:[%s3248_s7 + $0x150] sm:$0xff]  ;;  %v1174_v25 = vld [vmem:[%s3248_s7 + $0x168] sm:$0xff] }
 0x1bd   :  { %v1176_v26 = vld [vmem:[%s3248_s7 + $0x178] sm:$0xff] }
 0x1c2   :  { %v555_v33 = vpop.f32.mrb[0].mxu1 }
 0x1c3   :  { %v556_v35 = vadd.f32 %v555_v33, %v485_v31  ;;  %v557_v36 = vpop.f32.mrb[1].mxu1  ;;  %v1135_v31 = vld [vmem:[%s3248_s7 + $0x30] sm:$0xff]  ;;  %v1140_v33 = vld [vmem:[%s3248_s7 + $0x58] sm:$0xff] }
 0x1c4   :  { %v558_v41 = vadd.f32 %v557_v36, %v487_v32  ;;  %v1138_v32 = vld [vmem:[%s3248_s7 + $0x48] sm:$0xff]  ;;  %v1837_v34 = vpack.c.bf16 %v1135_v31, %v1133_v30  ;;  %v1137_v36 = vld [vmem:[%s3248_s7 + $0x40] sm:$0xff]  ;;  %v1175_v31 = vld [vmem:[%s3248_s7 + $0x170] sm:$0xff] }
 0x1c5   :  { %v700_v49 = vmax.f32 %v556_v35, 0.0  ;;  %v1839_v35 = vpack.c.bf16 %v1140_v33, %v1138_v32  ;;  %v1173_v30 = vld [vmem:[%s3248_s7 + $0x160] sm:$0xff]  ;;  %v1178_v32 = vld [vmem:[%s3248_s7 + $0x188] sm:$0xff]  ;;  %v1180_v33 = vld [vmem:[%s3248_s7 + $0x198] sm:$0xff] }
 0x1c6   :  { %v701_v44 = vmax.f32 %v558_v41, 0.0  ;;  %v1841_v41 = vpack.c.bf16 %v1139_v37, %v1137_v36  ;;  %v1177_v36 = vld [vmem:[%s3248_s7 + $0x180] sm:$0xff]  ;;  %v1179_v37 = vld [vmem:[%s3248_s7 + $0x190] sm:$0xff] }
 0x1c8   :  { %907 = vmatprep.mubr.f32.mxu1 %v701_v44  ;;  %1049 = vmatprep.mubr.f32.mxu0 %v701_v44  ;;  %v1143_v44 = vld [vmem:[%s3248_s7 + $0x70] sm:$0xff] }
 0x1c9   :  { %908 = vmatmul.mubr.f32.vlgmr.msra.gmra.mrb[6].mxu1 %v700_v49  ;;  %1050 = vmatmul.mubr.f32.vlgmr.msra.gmra.mrb[6].mxu0 %v700_v49  ;;  %v1845_v48 = vpack.c.bf16 %v1143_v44, %v1141_v43  ;;  %v1181_v43 = vld [vmem:[%s3248_s7 + $0x1a0] sm:$0xff]  ;;  %v1183_v44 = vld [vmem:[%s3248_s7 + $0x1b0] sm:$0xff] }
 0x1ca   :  { %1774 = vmatpush1.bf16.msra.mxu1 %v1773_v45  ;;  %1821 = vmatpush3.bf16.msra.mxu0 %v1820_v47  ;;  %v1146_v45 = vld [vmem:[%s3248_s7 + $0x88] sm:$0xff]  ;;  %v1148_v47 = vld [vmem:[%s3248_s7 + $0x98] sm:$0xff] }
 0x1cb   :  { %1776 = vmatprep.subr.bf16.mxu1 %v1775_v51  ;;  %1822 = vmatprep.subr.bf16.mxu0 %v1931_v50  ;;  %v1847_v49 = vpack.c.bf16 %v1148_v47, %v1146_v45  ;;  %v1145_v51 = vld [vmem:[%s3248_s7 + $0x80] sm:$0xff]  ;;  %v1186_v45 = vld [vmem:[%s3248_s7 + $0x1c8] sm:$0xff]  ;;  %v1188_v47 = vld [vmem:[%s3248_s7 + $0x1d8] sm:$0xff] }
 0x1cc   :  { %978 = vmatprep.mubr.f32.mxu1 %v1930_v3  ;;  %1508 = vmatprep.mubr.msk.f32.mxu0 %vm1932_vm2, %v1930_v3  ;;  %v1849_v57 = vpack.c.bf16 %v1147_v53, %v1145_v51  ;;  %v1185_v51 = vld [vmem:[%s3248_s7 + $0x1c0] sm:$0xff]  ;;  %v1187_v53 = vld [vmem:[%s3248_s7 + $0x1d0] sm:$0xff] }
 0x1cd   :  { %v1889_v55 = vpack.c.bf16 %v1187_v53, %v1185_v51 }
 0x1ce   :  { %1778 = vmatpush1.bf16.msra.mxu1 %v1777_v54  ;;  %1824 = vmatpush3.bf16.msra.mxu0 %v1823_v58  ;;  %v1149_v54 = vld [vmem:[%s3248_s7 + $0xa0] sm:$0xff]  ;;  %v1151_v58 = vld [vmem:[%s3248_s7 + $0xb0] sm:$0xff] }
 0x1cf   :  { %1780 = vmatprep.subr.bf16.mxu1 %v1779_v28  ;;  %1825 = vmatprep.subr.bf16.mxu0 %v1931_v50  ;;  %v1156_v28 = vld [vmem:[%s3248_s7 + $0xd8] sm:$0xff]  ;;  %v1853_v46 = vpack.c.bf16 %v1151_v58, %v1149_v54  ;;  %v1189_v54 = vld [vmem:[%s3248_s7 + $0x1e0] sm:$0xff]  ;;  %v1191_v58 = vld [vmem:[%s3248_s7 + $0x1f0] sm:$0xff] }
 0x1d0   :  { %v1855_v52 = vpack.c.bf16 %v1156_v28, %v1154_v19  ;;  %v1893_v19 = vpack.c.bf16 %v1191_v58, %v1189_v54  ;;  %v1194_v28 = vld [vmem:[%s3248_s7 + $0x208] sm:$0xff] }
 0x1d2   :  { %1782 = vmatpush1.bf16.msra.mxu1 %v1781_v62  ;;  %1827 = vmatpush3.bf16.msra.mxu0 %v1826_v63  ;;  %v1160_v62 = vld [vmem:[%s3248_s7 + $0xf8] sm:$0xff]  ;;  %v1857_v63 = vpack.c.bf16 %v1155_v60, %v1153_v59 }
 0x1d3   :  { %1784 = vmatprep.subr.bf16.mxu1 %v1783_v1  ;;  %1828 = vmatprep.subr.bf16.mxu0 %v1931_v50  ;;  %v1130_v50 = vld [vmem:[%s3248_s7 + $0x8] sm:$0xff]  ;;  %v1859_v0 = vpack.c.bf16 %v1160_v62, %v1158_v61  ;;  %v1157_v1 = vld [vmem:[%s3248_s7 + $0xe0] sm:$0xff] }
 0x1d4   :  { %v1831_v23 = vpack.c.bf16 %v1132_v20, %v1130_v50  ;;  %v1172_v50 = vld [vmem:[%s3248_s7 + $0x158] sm:$0xff]  ;;  %v703_v62 = vld [vmem:[%s3249_s6] sm:$0x7] }
 0x1d6   :  { %1786 = vmatpush1.bf16.msra.mxu1 %v1785_v6  ;;  %1830 = vmatpush3.bf16.msra.mxu0 %v1829_v7  ;;  %v1861_v6 = vpack.c.bf16 %v1159_v2, %v1157_v1  ;;  %v1863_v7 = vpack.c.bf16 %v1164_v5, %v1162_v4  ;;  %v832_v1 = vrot.slane %v703_v62, %v2395_v12 }
 0x1d7   :  { %1832 = vmatprep.subr.bf16.mxu0 %v1831_v23  ;;  %v1169_v23 = vld [vmem:[%s3248_s7 + $0x140] sm:$0xff] }
 0x1e2   :  { %v1445_v8 = vpop.f32.mrb[2].mxu1 }
 0x1e3   :  { %v1446_v9 = vpop.f32.mrb[3].mxu1 }
 0x1e4   :  { %v1447_v11 = vadd.f32 %v1446_v9, %v1445_v8  ;;  %v1161_v8 = vld [vmem:[%s3248_s7 + $0x100] sm:$0xff]  ;;  %v1163_v9 = vld [vmem:[%s3248_s7 + $0x110] sm:$0xff] }
 0x1e6   :  { %v627_v14 = vadd.f32 %v1447_v11, %v410_v13  ;;  %v1166_v11 = vld [vmem:[%s3248_s7 + $0x128] sm:$0xff]  ;;  %v1168_v13 = vld [vmem:[%s3248_s7 + $0x138] sm:$0xff] }
 0x212   :  { %v696_v15 = vpop.f32.mrb[4].mxu1 }
 0x213   :  { %v697_v16 = vadd.f32 %v696_v15, %v627_v14  ;;  %v698_v17 = vpop.f32.mrb[5].mxu1  ;;  %v1865_v14 = vpack.c.bf16 %v1163_v9, %v1161_v8  ;;  %v1867_v15 = vpack.c.bf16 %v1168_v13, %v1166_v11  ;;  %v1193_v11 = vld [vmem:[%s3248_s7 + $0x200] sm:$0xff]  ;;  %v1195_v13 = vld [vmem:[%s3248_s7 + $0x210] sm:$0xff] }
 0x214   :  { %v1167_v17 = vld [vmem:[%s3248_s7 + $0x130] sm:$0xff] }
 0x215   :  { %v702_v18 = vmax.f32 %v697_v16, 0.0  ;;  %v1165_v16 = vld [vmem:[%s3248_s7 + $0x120] sm:$0xff] }
 0x216   :  { %v1869_v20 = vpack.c.bf16 %v1167_v17, %v1165_v16  ;;  %v1897_v17 = vpack.c.bf16 %v1195_v13, %v1193_v11 }
 0x217   :  { %1408 = vmatmul.mubr.msk.f32.vlgmr.msra.gmra.mrb[6].mxu1 %vm414_vm1, %v702_v18  ;;  %1509 = vmatmul.mubr.msk.f32.vlgmr.msra.gmra.mrb[8].mxu0 %vm414_vm1, %v702_v18  ;;  %v1170_v18 = vld [vmem:[%s3248_s7 + $0x148] sm:$0xff] }
 0x218   :  { %1834 = vmatpush1.bf16.msra.mxu0 %v1833_v27  ;;  %v1871_v22 = vpack.c.bf16 %v1172_v50, %v1170_v18  ;;  %v1873_v27 = vpack.c.bf16 %v1171_v24, %v1169_v23  ;;  %v1202_v23 = vld [vmem:[%s3248_s7 + $0x248] sm:$0xff]  ;;  %v1204_v24 = vld [vmem:[%s3248_s7 + $0x258] sm:$0xff] }
 0x219   :  { %1836 = vmatprep.subr.bf16.mxu0 %v1835_v29  ;;  %v1875_v29 = vpack.c.bf16 %v1176_v26, %v1174_v25  ;;  %v1903_v26 = vpack.c.bf16 %v1204_v24, %v1202_v23 }
 0x21c   :  { %1838 = vmatpush1.bf16.msra.mxu0 %v1837_v34  ;;  %v1877_v34 = vpack.c.bf16 %v1175_v31, %v1173_v30  ;;  %v1206_v30 = vld [vmem:[%s3248_s7 + $0x268] sm:$0xff]  ;;  %v1208_v31 = vld [vmem:[%s3248_s7 + $0x278] sm:$0xff] }
 0x21d   :  { %1840 = vmatprep.subr.bf16.mxu0 %v1839_v35  ;;  %v1879_v35 = vpack.c.bf16 %v1180_v33, %v1178_v32  ;;  %v1907_v32 = vpack.c.bf16 %v1208_v31, %v1206_v30  ;;  %v1205_v33 = vld [vmem:[%s3248_s7 + $0x260] sm:$0xff] }
 0x220   :  { %1842 = vmatpush1.bf16.msra.mxu0 %v1841_v41  ;;  %v1881_v41 = vpack.c.bf16 %v1179_v37, %v1177_v36  ;;  %v16_v37 = vstv %s3250_s10 }
 0x221   :  { %1844 = vmatprep.subr.bf16.mxu0 %v1843_v42  ;;  %v1883_v42 = vpack.c.bf16 %v1184_v39, %v1182_v38  ;;  %17 = vst [vmem:[#allocation2] sm:$0x1] %v16_v37  ;;  %v1128_v38 = vld [vmem:[%s3251_s8] sm:$0x3] }
 0x222   :  { %v1213_v39 = vrot.slane %v1128_v38, %v2390_v10 }
 0x224   :  { %1846 = vmatpush1.bf16.msra.mxu0 %v1845_v48  ;;  %v1885_v48 = vpack.c.bf16 %v1183_v44, %v1181_v43 }
 0x225   :  { %1848 = vmatprep.subr.bf16.mxu0 %v1847_v49  ;;  %v1887_v49 = vpack.c.bf16 %v1188_v47, %v1186_v45 }
 0x228   :  { %1850 = vmatpush1.bf16.msra.mxu0 %v1849_v57  ;;  %v1192_v57 = vld [vmem:[%s3248_s7 + $0x1f8] sm:$0xff] }
 0x229   :  { %1852 = vmatprep.subr.bf16.mxu0 %v1851_v40  ;;  %v1891_v40 = vpack.c.bf16 %v1192_v57, %v1190_v56 }
 0x22c   :  { %1854 = vmatpush1.bf16.msra.mxu0 %v1853_v46  ;;  %v1196_v46 = vld [vmem:[%s3248_s7 + $0x218] sm:$0xff] }
 0x22d   :  { %1856 = vmatprep.subr.bf16.mxu0 %v1855_v52  ;;  %v1895_v52 = vpack.c.bf16 %v1196_v46, %v1194_v28 }
 0x230   :  { %1858 = vmatpush1.bf16.msra.mxu0 %v1857_v63  ;;  %v836_v63 = vrot.slane %v703_v62, %v2407_v21 }
 0x231   :  { %1860 = vmatprep.subr.bf16.mxu0 %v1859_v0  ;;  %v828_v0 = vrot.slane %v703_v62, %v2390_v10 }
 0x234   :  { %1862 = vmatpush1.bf16.msra.mxu0 %v1861_v6 }
 0x235   :  { %1864 = vmatprep.subr.bf16.mxu0 %v1863_v7 }
 0x238   :  { %1866 = vmatpush1.bf16.msra.mxu0 %v1865_v14  ;;  %v1198_v14 = vld [vmem:[%s3248_s7 + $0x228] sm:$0xff] }
 0x239   :  { %1868 = vmatprep.subr.bf16.mxu0 %v1867_v15  ;;  %v1200_v15 = vld [vmem:[%s3248_s7 + $0x238] sm:$0xff] }
 0x23a   :  { %v1899_v50 = vpack.c.bf16 %v1200_v15, %v1198_v14 }
 0x23c   :  { %1870 = vmatpush1.bf16.msra.mxu0 %v1869_v20  ;;  %v1197_v20 = vld [vmem:[%s3248_s7 + $0x220] sm:$0xff] }
 0x23d   :  { %1872 = vmatprep.subr.bf16.mxu0 %v1871_v22  ;;  %v1199_v22 = vld [vmem:[%s3248_s7 + $0x230] sm:$0xff] }
 0x23e   :  { %v1901_v25 = vpack.c.bf16 %v1199_v22, %v1197_v20 }
 0x240   :  { %1874 = vmatpush1.bf16.msra.mxu0 %v1873_v27  ;;  %v1201_v27 = vld [vmem:[%s3248_s7 + $0x240] sm:$0xff] }
 0x241   :  { %1876 = vmatprep.subr.bf16.mxu0 %v1875_v29  ;;  %v1203_v29 = vld [vmem:[%s3248_s7 + $0x250] sm:$0xff] }
 0x244   :  { %1878 = vmatpush1.bf16.msra.mxu0 %v1877_v34  ;;  %v1207_v34 = vld [vmem:[%s3248_s7 + $0x270] sm:$0xff] }
 0x245   :  { %1880 = vmatprep.subr.bf16.mxu0 %v1879_v35  ;;  %v1909_v35 = vpack.c.bf16 %v1207_v34, %v1205_v33 }
 0x248   :  { %1882 = vmatpush1.bf16.msra.mxu0 %v1881_v41  ;;  %v1217_v41 = vrot.slane %v1128_v38, %v2395_v12 }
 0x249   :  { %1884 = vmatprep.subr.bf16.mxu0 %v1883_v42  ;;  %v1367_v42 = vld [vmem:[%s3252_s9] sm:$0x3] }
 0x24a   :  { %v1373_v47 = vrot.slane %v1367_v42, %v2390_v10 }
 0x24c   :  { %1886 = vmatpush1.bf16.msra.mxu0 %v1885_v48 }
 0x24d   :  { %1888 = vmatprep.subr.bf16.mxu0 %v1887_v49  ;;  %v1377_v49 = vrot.slane %v1367_v42, %v2395_v12 }
 0x250   :  { %1890 = vmatpush1.bf16.msra.mxu0 %v1889_v55 }
 0x251   :  { %1892 = vmatprep.subr.bf16.mxu0 %v1891_v40  ;;  %v1411_v40 = vld [vmem:[#allocation2] ss:$0 sm:$0xff] }
 0x254   :  { %1894 = vmatpush1.bf16.msra.mxu0 %v1893_v19 }
 0x255   :  { %1896 = vmatprep.subr.bf16.mxu0 %v1895_v52 }
 0x29c   :  { %v1480_v59 = vpop.f32.mrb[6].mxu0 }
 0x29d   :  { %v1481_v60 = vpop.f32.mrb[7].mxu0 }
 0x29e   :  { %v1482_v61 = vadd.f32 %v1481_v60, %v1480_v59 }
 0x2a0   :  { %v1052_v2 = vadd.f32 %v1482_v61, %v836_v63 }
 0x2ea   :  { %v980_v4 = vpop.f32.mrb[6].mxu1  ;;  %v1121_v5 = vpop.f32.mrb[8].mxu0 }
 0x2eb   :  { %v1915_v6 = vadd.f32 %v980_v4, %v828_v0  ;;  %v1122_v7 = vadd.f32 %v1121_v5, %v1052_v2  ;;  %v982_v8 = vpop.f32.mrb[7].mxu1  ;;  %v1510_v9 = vpop.f32.mrb[9].mxu0 }
 0x2ec   :  { %v1916_v21 = vadd.f32 %v982_v8, %v832_v1 }
 0x2ed   :  { %v1125_v18 = vmax.f32 %v1915_v6, 0.0  ;;  %v1127_v36 = vmax.f32 %v1122_v7, 0.0 }
 0x2ee   :  { %v1126_v16 = vmax.f32 %v1916_v21, 0.0 }
 0x2f0   :  { %1287 = vmatprep.mubr.f32.mxu0 %v1126_v16 }
 0x2f1   :  { %1288 = vmatmul.mubr.f32.vlgmr.msra.gmra.mrb[10].mxu0 %v1125_v18 }
 0x2f2   :  { %1898 = vmatpush1.bf16.msra.mxu0 %v1897_v17  ;;  %1358 = vmatprep.mubr.f32.mxu0 %v1930_v3  ;;  %v1905_v3 = vpack.c.bf16 %v1203_v29, %v1201_v27 }
 0x2f3   :  { %1900 = vmatprep.subr.bf16.mxu0 %v1899_v50 }
 0x2f6   :  { %1902 = vmatpush1.bf16.msra.mxu0 %v1901_v25 }
 0x2f7   :  { %1904 = vmatprep.subr.bf16.mxu0 %v1903_v26 }
 0x2fa   :  { %1906 = vmatpush1.bf16.msra.mxu0 %v1905_v3 }
 0x2fb   :  { %1908 = vmatprep.subr.bf16.mxu0 %v1907_v32 }
 0x2fe   :  { %1910 = vmatpush1.bf16.msra.mxu0 %v1909_v35 }
 0x301   :  { %1410 = vmatmul.mubr.msk.f32.vlgmr.msra.gmra.mrb[10].mxu0 %vm414_vm1, %v1127_v36 }
 0x3d4   :  { %v1360_v43 = vpop.f32.mrb[10].mxu0 }
 0x3d5   :  { %v1917_v44 = vadd.f32 %v1360_v43, %v1213_v39  ;;  %v1362_v45 = vpop.f32.mrb[11].mxu0 }
 0x3d6   :  { %v1918_v48 = vadd.f32 %v1362_v45, %v1217_v41 }
 0x3d7   :  { %v1365_v51 = vmax.f32 %v1917_v44, 0.0 }
 0x3d8   :  { %v1366_v53 = vmax.f32 %v1918_v48, 0.0 }
 0x3d9   :  { %v1380_v55 = vmul.f32 %v1373_v47, %v1365_v51 }
 0x3da   :  { %v1381_v56 = vmul.f32 %v1377_v49, %v1366_v53 }
 0x3dc   :  { %v1382_v57 = vadd.f32 %v1381_v56, %v1380_v55 }
 0x3de   :  { %1383 = vadd.xlane.f32.xlu0 %v1382_v57 }
 0x46b   :  { %v1384_v54 = vpop.xlane.xlu0 %1383 }
 0x46c   :  { %v1391_v58 = vadd.f32 %v1411_v40, %v1384_v54 }
 0x46e   :  { %v1412_v19 = vmul.f32 -1.442695, %v1391_v58 }
 0x470   :  { %1926 = vpow2.f32 %v1412_v19 }
 0x47a   :  { %v1927_v28 = vpop.eup %1926 }
 0x47b   :  { %v1395_v46 = vadd.f32 1.0, %v1927_v28 }
 0x47d   :  { %1928 = vrcp.f32 %v1395_v46 }
 0x487   :  { %v1929_v52 = vpop.eup %1928 }
 0x488   :  { %1399 = vst.msk [vmem:[%s3253_s11] sm:$0xff] %vm1398_vm3, %v1929_v52 }

</bundles_post_ra>
